<compile_context>
chip_gen: v5e
topology: v5e:2x2
jax: 0.10.0
libtpu: 0.0.40
codegen_flags: <defaults>
</compile_context>

<pallas_src>
import jax
import jax.numpy as jnp
from jax.experimental import pallas as pl
from jax.experimental.pallas import tpu as pltpu

EPS = 1e-3  # BatchNorm2d eps=0.001


def conv1x1_bn_kernel(w_ref, x_ref, gb_ref, o_ref):
    # w_ref: (C_out, C_in), x_ref: (C_in, M), gb_ref: (C_out, 2) [gamma|beta]
    # o_ref: (C_out, M)
    w = w_ref[...]
    x = x_ref[...]
    y = jnp.dot(w, x, preferred_element_type=jnp.float32)          # (C_out, M)

    inv_m = 1.0 / y.shape[1]                                       # static
    # Exact identity: row-sum of (w @ x) == w @ col-sum(x).  Replaces a
    # (C_out, M) XLU lane-reduce with a (C_in, M) reduce + tiny MXU matvec.
    x_colsum = jnp.sum(x, axis=-1, keepdims=True)                  # (C_in, 1)
    s1 = jnp.dot(w, x_colsum, preferred_element_type=jnp.float32)  # (C_out, 1)
    s2 = jnp.sum(y * y, axis=-1, keepdims=True)                    # (C_out, 1)

    mean = s1 * inv_m
    # One-pass variance is cancellation-prone; clamp so rsqrt can't see <0.
    var = jnp.maximum(s2 * inv_m - mean * mean, 0.0)

    gamma = gb_ref[:, 0:1]                                         # (C_out, 1)
    beta = gb_ref[:, 1:2]                                          # (C_out, 1)
    scale = gamma * jax.lax.rsqrt(var + EPS)                       # (C_out, 1)
    shift = beta - mean * scale                                    # (C_out, 1)

    o_ref[...] = (y * scale + shift).astype(o_ref.dtype)


def conv1x1_batchnorm(x_nchw, weight_oi, gamma, beta):
    """x_nchw: (N, C_in, H, W); weight_oi: (C_out, C_in); gamma/beta: (C_out,)."""
    N, C_in, H, W = x_nchw.shape
    C_out = weight_oi.shape[0]
    M = N * H * W

    # Channels on sublanes, spatial on lanes. For N == 1 this is a pure (free)
    # reshape of contiguous NCHW memory -- no transpose kernels.
    if N == 1:
        x_mat = x_nchw.reshape(C_in, M)
    else:
        x_mat = jnp.transpose(x_nchw, (1, 0, 2, 3)).reshape(C_in, M)

    # Single merged BN-param input: col 0 = gamma, col 1 = beta.
    gb = jnp.stack([gamma, beta], axis=1).astype(jnp.float32)      # (C_out, 2)

    vmem = pltpu.MemorySpace.VMEM
    out_mat = pl.pallas_call(
        conv1x1_bn_kernel,
        out_shape=jax.ShapeDtypeStruct((C_out, M), jnp.float32),
        in_specs=[
            pl.BlockSpec(memory_space=vmem),   # weight (C_out, C_in)
            pl.BlockSpec(memory_space=vmem),   # x_mat  (C_in, M)
            pl.BlockSpec(memory_space=vmem),   # gb     (C_out, 2)
        ],
        out_specs=pl.BlockSpec(memory_space=vmem),
        cost_estimate=pl.CostEstimate(
            flops=2 * C_out * C_in * M,
            bytes_accessed=4 * (C_in * M + C_out * C_in + C_out * M + 2 * C_out),
            transcendentals=C_out,
        ),
    )(weight_oi, x_mat, gb)

    # Back to NCHW. For N == 1 this is again a free reshape.
    if N == 1:
        return out_mat.reshape(1, C_out, H, W)
    return jnp.transpose(out_mat.reshape(C_out, N, H, W), (1, 0, 2, 3))


if __name__ == "__main__":
    key = jax.random.PRNGKey(0)
    k_x, k_w = jax.random.split(key)

    N, C_in, H, W = 1, 80, 14, 14
    C_out = 184

    x = jax.random.normal(k_x, (N, C_in, H, W), dtype=jnp.float32)
    # Conv2d(80, 184, 1x1, bias=False) weight, deterministic init.
    weight = jax.random.normal(k_w, (C_out, C_in), dtype=jnp.float32) * 0.05
    # BatchNorm2d affine params: default init gamma=1, beta=0.
    gamma = jnp.ones((C_out,), dtype=jnp.float32)
    beta = jnp.zeros((C_out,), dtype=jnp.float32)

    out = conv1x1_batchnorm(x, weight, gamma, beta)
    jax.block_until_ready(out)

    # Sanity check against a pure-JAX reference of the same math.
    x_mat = x.reshape(C_in, H * W)
    y_ref = weight @ x_mat                                      # (C_out, M)
    mu = y_ref.mean(axis=1, keepdims=True)
    var = ((y_ref - mu) ** 2).mean(axis=1, keepdims=True)
    ref = (y_ref - mu) / jnp.sqrt(var + EPS) * gamma[:, None] + beta[:, None]
    ref = ref.reshape(1, C_out, H, W)

    assert out.shape == (N, C_out, H, W)
    assert jnp.allclose(out, ref, atol=1e-4, rtol=1e-4)

    print("KERNEL_OK")
</pallas_src>

<mosaic_0001>
module attributes {stable_mosaic.version = 11 : i64} {
  func.func @conv1x1_bn_kernel(%arg0: memref<184x80xf32, #tpu.memory_space<vmem>>, %arg1: memref<80x196xf32, #tpu.memory_space<vmem>>, %arg2: memref<184x2xf32, #tpu.memory_space<vmem>>, %arg3: memref<184x196xf32, #tpu.memory_space<vmem>>) attributes {dimension_semantics = [], scalar_prefetch = 0 : i64, scratch_operands = 0 : i64, tpu.core_type = #tpu.core_type<tc>} {
    %c0 = arith.constant 0 : index
    %c0_0 = arith.constant 0 : index
    %0 = vector.load %arg0[%c0, %c0_0] : memref<184x80xf32, #tpu.memory_space<vmem>>, vector<184x80xf32>
    %c0_1 = arith.constant 0 : index
    %c0_2 = arith.constant 0 : index
    %1 = vector.load %arg1[%c0_1, %c0_2] : memref<80x196xf32, #tpu.memory_space<vmem>>, vector<80x196xf32>
    %cst = arith.constant dense<0.000000e+00> : vector<184x196xf32>
    %2 = tpu.matmul %0, %1, %cst {dimension_numbers = #tpu.dot_dimension_numbers<[1], [0], [0], [1], [0, 0, 1, 1], [], []>} : vector<184x80xf32>, vector<80x196xf32>, vector<184x196xf32> -> vector<184x196xf32>
    %cst_3 = arith.constant dense<0.000000e+00> : vector<80xf32>
    %3 = vector.multi_reduction <add>, %1, %cst_3 [1] : vector<80x196xf32> to vector<80xf32>
    %4 = vector.shape_cast %3 : vector<80xf32> to vector<80x1xf32>
    %cst_4 = arith.constant dense<0.000000e+00> : vector<184x1xf32>
    %5 = tpu.matmul %0, %4, %cst_4 {dimension_numbers = #tpu.dot_dimension_numbers<[1], [0], [0], [1], [0, 0, 1, 1], [], []>} : vector<184x80xf32>, vector<80x1xf32>, vector<184x1xf32> -> vector<184x1xf32>
    %6 = arith.mulf %2, %2 : vector<184x196xf32>
    %cst_5 = arith.constant dense<0.000000e+00> : vector<184xf32>
    %7 = vector.multi_reduction <add>, %6, %cst_5 [1] : vector<184x196xf32> to vector<184xf32>
    %8 = vector.shape_cast %7 : vector<184xf32> to vector<184x1xf32>
    %cst_6 = arith.constant 0.00510204071 : f32
    %9 = vector.broadcast %cst_6 : f32 to vector<184x1xf32>
    %10 = arith.mulf %5, %9 : vector<184x1xf32>
    %cst_7 = arith.constant 0.00510204071 : f32
    %11 = vector.broadcast %cst_7 : f32 to vector<184x1xf32>
    %12 = arith.mulf %8, %11 : vector<184x1xf32>
    %13 = arith.mulf %10, %10 : vector<184x1xf32>
    %14 = arith.subf %12, %13 : vector<184x1xf32>
    %cst_8 = arith.constant 0.000000e+00 : f32
    %15 = vector.broadcast %cst_8 : f32 to vector<184x1xf32>
    %16 = arith.maximumf %14, %15 : vector<184x1xf32>
    %c0_9 = arith.constant 0 : index
    %c0_10 = arith.constant 0 : index
    %17 = vector.load %arg2[%c0_9, %c0_10] : memref<184x2xf32, #tpu.memory_space<vmem>>, vector<184x1xf32>
    %c0_11 = arith.constant 0 : index
    %c1 = arith.constant 1 : index
    %18 = vector.load %arg2[%c0_11, %c1] : memref<184x2xf32, #tpu.memory_space<vmem>>, vector<184x1xf32>
    %cst_12 = arith.constant 1.000000e-03 : f32
    %19 = vector.broadcast %cst_12 : f32 to vector<184x1xf32>
    %20 = arith.addf %16, %19 : vector<184x1xf32>
    %21 = math.rsqrt %20 : vector<184x1xf32>
    %22 = arith.mulf %17, %21 : vector<184x1xf32>
    %23 = arith.mulf %10, %22 : vector<184x1xf32>
    %24 = arith.subf %18, %23 : vector<184x1xf32>
    %25 = vector.broadcast %22 : vector<184x1xf32> to vector<184x196xf32>
    %26 = arith.mulf %2, %25 : vector<184x196xf32>
    %27 = vector.broadcast %24 : vector<184x1xf32> to vector<184x196xf32>
    %28 = arith.addf %26, %27 : vector<184x196xf32>
    %c0_13 = arith.constant 0 : index
    %c0_14 = arith.constant 0 : index
    %29 = vector.load %arg3[%c0_13, %c0_14] : memref<184x196xf32, #tpu.memory_space<vmem>>, vector<184x196xf32>
    tpu.vector_store %arg3[%c0_13, %c0_14], %28 {strides = array<i32>} : memref<184x196xf32, #tpu.memory_space<vmem>>, vector<184x196xf32>,
    return
  }
}

</mosaic_0001>

<bundles_post_ra>
// kernel: tpu_custom_call.1
= control target key start
LH: loop header
LB: loop body
LE: loop exit
PB: predicated region body
PF: predicated region fallthrough
CT: control target
= control target key end

     0   :  { %vm300_vm0 = vcmask 556032   ;;  %s2961_s0 = inlined_call_operand.vmem [shape: f32[184,80], index: 0, kind: input, shape index: {}]   ;;  %s2962_s1 = inlined_call_operand.vmem [shape: f32[80,196], index: 1, kind: input, shape index: {}]   ;;  %s2963_s2 = inlined_call_operand.vmem [shape: f32[184,2], index: 2, kind: input, shape index: {}]   ;;  %s2964_s3 = inlined_call_operand.hbm [shape: f32[184,196], index: 3, kind: output, shape index: {}]  }
   0x1   :  { %v56_v0 = vld [vmem:[%s2962_s1 + $0x90] sm:$0xff]  ;;  %v54_v1 = vld [vmem:[%s2962_s1 + $0x80] sm:$0xff]  ;;  %v1723_v2 = vld [vmem:[%s2962_s1 + $0x98] sm:$0xff] }
   0x2   :  { %1572 = vmatpush.msra.mxu3 %v56_v0  ;;  %v337_v3 = vsel %vm300_vm0, %v1723_v2, 0.0  ;;  %v1730_v4 = vld [vmem:[%s2962_s1] sm:$0xff]  ;;  %v1735_v5 = vld [vmem:[%s2962_s1 + $0x8] sm:$0xff]  ;;  %220 = vmatpush.msra.mxu1 %v1723_v2  ;;  %v52_v8 = vld [vmem:[%s2962_s1 + $0x70] sm:$0xff] }
   0x3   :  { %v338_v6 = vadd.f32 %v337_v3, %v56_v0  ;;  %v301_v7 = vsel %vm300_vm0, %v1735_v5, 0.0  ;;  %134 = vmatpush.msra.mxu0 %v56_v0  ;;  %v1746_v9 = vld [vmem:[%s2962_s1 + $0x88] sm:$0xff]  ;;  %v1753_v11 = vld [vmem:[%s2962_s1 + $0x78] sm:$0xff]  ;;  %v50_v12 = vld [vmem:[%s2962_s1 + $0x60] sm:$0xff] }
   0x4   :  { %1573 = vmatpush.msra.mxu3 %v54_v1  ;;  %v302_v10 = vadd.f32 %v301_v7, %v1730_v4  ;;  %221 = vmatpush.msra.mxu1 %v1746_v9  ;;  %v329_v13 = vsel %vm300_vm0, %v1753_v11, 0.0  ;;  %v1763_v14 = vld [vmem:[%s2962_s1 + $0x18] sm:$0xff]  ;;  %v333_v16 = vsel %vm300_vm0, %v1746_v9, 0.0  ;;  %v1770_v17 = vld [vmem:[%s2962_s1 + $0x68] sm:$0xff]  ;;  %v48_v18 = vld [vmem:[%s2962_s1 + $0x50] sm:$0xff] }
   0x5   :  { %339 = vadd.xlane.f32.xlu1 %v338_v6  ;;  %135 = vmatpush.msra.mxu0 %v54_v1  ;;  %v330_v15 = vadd.f32 %v329_v13, %v52_v8  ;;  %v40_v19 = vld [vmem:[%s2962_s1 + $0x10] sm:$0xff]  ;;  %v305_v20 = vsel %vm300_vm0, %v1763_v14, 0.0  ;;  %v49_v21 = vld [vmem:[%s2962_s1 + $0x58] sm:$0xff]  ;;  %v46_v22 = vld [vmem:[%s2962_s1 + $0x40] sm:$0xff]  ;;  %v334_v23 = vadd.f32 %v333_v16, %v54_v1  ;;  %v325_v24 = vsel %vm300_vm0, %v1770_v17, 0.0 }
   0x6   :  { %303 = vadd.xlane.f32.xlu0 %v302_v10  ;;  %1574 = vmatpush.msra.mxu3 %v52_v8  ;;  %v306_v25 = vadd.f32 %v305_v20, %v40_v19  ;;  %v47_v26 = vld [vmem:[%s2962_s1 + $0x48] sm:$0xff] }
   0x7   :  { %222 = vmatpush.msra.mxu1 %v1753_v11  ;;  %136 = vmatpush.msra.mxu0 %v52_v8 }
   0x8   :  { %1575 = vmatpush.msra.mxu3 %v50_v12  ;;  %331 = vadd.xlane.f32.xlu2 %v330_v15 }
   0x9   :  { %223 = vmatpush.msra.mxu1 %v1770_v17  ;;  %137 = vmatpush.msra.mxu0 %v50_v12 }
   0xa   :  { %1576 = vmatpush.msra.mxu3 %v48_v18 }
   0xb   :  { %8 = vsyncpa [#allocation3], 0  ;;  %v44_v27 = vld [vmem:[%s2962_s1 + $0x30] sm:$0xff]  ;;  %224 = vmatpush.msra.mxu1 %v49_v21  ;;  %138 = vmatpush.msra.mxu0 %v48_v18  ;;  %v326_v28 = vadd.f32 %v325_v24, %v50_v12  ;;  %v45_v29 = vld [vmem:[%s2962_s1 + $0x38] sm:$0xff]  ;;  %v317_v32 = vsel %vm300_vm0, %v47_v26, 0.0  ;;  %v321_v33 = vsel %vm300_vm0, %v49_v21, 0.0 }
   0xc   :  { %1577 = vmatpush.msra.mxu3 %v46_v22  ;;  %v42_v30 = vld [vmem:[%s2962_s1 + $0x20] sm:$0xff]  ;;  %v43_v31 = vld [vmem:[%s2962_s1 + $0x28] sm:$0xff]  ;;  %v318_v34 = vadd.f32 %v317_v32, %v46_v22  ;;  %v313_v35 = vsel %vm300_vm0, %v45_v29, 0.0  ;;  %v322_v36 = vadd.f32 %v321_v33, %v48_v18  ;;  %v1811_v37 = vld [vmem:[%s2961_s0 + $0x90] sm:$0xff]  ;;  %vm58_vm1 = vcmask 654336   ;;  %s1689_s16 = smov 1  }
   0xd   :  { %335 = vadd.xlane.f32.xlu1 %v334_v23  ;;  %225 = vmatpush.msra.mxu1 %v47_v26  ;;  %v314_v38 = vadd.f32 %v313_v35, %v44_v27  ;;  %v1820_v39 = vld [vmem:[%s2961_s0] sm:$0xff]  ;;  %v309_v40 = vsel %vm300_vm0, %v43_v31, 0.0  ;;  %v1833_v42 = vld [vmem:[%s2961_s0 + $0x98] sm:$0xff]  ;;  %v1842_v43 = vld [vmem:[%s2961_s0 + $0x8] sm:$0xff]  ;;  %s1491_s7 = sshll.u32 %s2964_s3, 4  ;;  %s1692_s8 = smov 256   ;;  %s1492_s7 = int_to_ptr.hbm [resolvable:$true] %s1491_s7 }
   0xe   :  { %307 = vadd.xlane.f32.xlu0 %v306_v25  ;;  %1578 = vmatpush.msra.mxu3 %v44_v27  ;;  %v310_v41 = vadd.f32 %v309_v40, %v42_v30  ;;  %v1852_v44 = vld [vmem:[%s2961_s0 + $0xa0] sm:$0xff]  ;;  %v1859_v45 = vld [vmem:[%s2961_s0 + $0x10] sm:$0xff]  ;;  %v1869_v46 = vld [vmem:[%s2961_s0 + $0xa8] sm:$0xff]  ;;  %s1693_s9 = smov 16  }
   0xf   :  { %139 = vmatpush.msra.mxu0 %v46_v22  ;;  %226 = vmatpush.msra.mxu1 %v45_v29  ;;  %v1877_v47 = vld [vmem:[%s2961_s0 + $0x18] sm:$0xff]  ;;  %v1886_v48 = vld [vmem:[%s2961_s0 + $0xb0] sm:$0xff]  ;;  %v1893_v49 = vld [vmem:[%s2961_s0 + $0x20] sm:$0xff] }
  0x10   :  { %1579 = vmatpush.msra.mxu3 %v42_v30  ;;  %327 = vadd.xlane.f32.xlu2 %v326_v28  ;;  %v1904_v50 = vld [vmem:[%s2961_s0 + $0x28] sm:$0xff]  ;;  %v1915_v51 = vld [vmem:[%s2961_s0 + $0x30] sm:$0xff]  ;;  %v1926_v52 = vld [vmem:[%s2961_s0 + $0x38] sm:$0xff] }
  0x11   :  { %140 = vmatpush.msra.mxu0 %v44_v27  ;;  %227 = vmatpush.msra.mxu1 %v43_v31  ;;  %v1937_v53 = vld [vmem:[%s2961_s0 + $0x40] sm:$0xff]  ;;  %v1948_v54 = vld [vmem:[%s2961_s0 + $0x48] sm:$0xff]  ;;  %v1957_v55 = vld [vmem:[%s2961_s0 + $0x50] sm:$0xff] }
  0x12   :  { %1580 = vmatpush.msra.mxu3 %v40_v19  ;;  %v1966_v56 = vld [vmem:[%s2961_s0 + $0x58] sm:$0xff]  ;;  %v1975_v57 = vld [vmem:[%s2961_s0 + $0x60] sm:$0xff]  ;;  %v1984_v61 = vld [vmem:[%s2961_s0 + $0x68] sm:$0xff] }
  0x13   :  { %141 = vmatpush.msra.mxu0 %v42_v30  ;;  %228 = vmatpush.msra.mxu1 %v1763_v14  ;;  %v1993_v1 = vld [vmem:[%s2961_s0 + $0x70] sm:$0xff]  ;;  %v2025_v12 = vld [vmem:[%s2961_s0 + $0x80] sm:$0xff]  ;;  %v2049_v20 = vld [vmem:[%s2961_s0 + $0x88] sm:$0xff] }
  0x14   :  { %1581 = vmatpush.msra.mxu3 %v1730_v4 }
  0x15   :  { %1521 = vmatmul.msk.f32.vlgmr.msra.gmra.mxu3 %vm58_vm1, %v1811_v37  ;;  %319 = vadd.xlane.f32.xlu1 %v318_v34 }
  0x16   :  { %323 = vadd.xlane.f32.xlu0 %v322_v36  ;;  %142 = vmatpush.msra.mxu0 %v40_v19 }
  0x17   :  { %229 = vmatpush.msra.mxu1 %v1735_v5  ;;  %1582 = vmatpush.msrb.mxu3 %v1723_v2 }
  0x18   :  { %315 = vadd.xlane.f32.xlu2 %v314_v38  ;;  %143 = vmatpush.msra.mxu0 %v1730_v4 }
  0x19   :  { %1526 = vmatmul.msk.f32.vlgmr.msra.gmra.mxu1 %vm58_vm1, %v1820_v39  ;;  %1503 = vmatmul.msk.f32.vlgmr.msra.gmra.mxu0 %vm58_vm1, %v1820_v39 }
  0x1a   :  { %1583 = vmatpush.msrb.mxu3 %v1746_v9 }
  0x1c   :  { %1584 = vmatpush.msrb.mxu3 %v1753_v11 }
  0x1d   :  { %1522 = vmatmul.msk.f32.gmra.mxu3 %vm58_vm1, %v1833_v42 }
  0x1e   :  { %311 = vadd.xlane.f32.xlu0 %v310_v41  ;;  %1585 = vmatpush.msrb.mxu3 %v1770_v17 }
  0x20   :  { %1586 = vmatpush.msrb.mxu3 %v49_v21 }
  0x21   :  { %1527 = vmatmul.msk.f32.gmra.mxu1 %vm58_vm1, %v1842_v43  ;;  %1504 = vmatmul.msk.f32.gmra.mxu0 %vm58_vm1, %v1842_v43 }
  0x22   :  { %1587 = vmatpush.msrb.mxu3 %v47_v26 }
  0x24   :  { %1588 = vmatpush.msrb.mxu3 %v45_v29 }
  0x25   :  { %1523 = vmatmul.msk.f32.gmra.mxu3 %vm58_vm1, %v1852_v44 }
  0x26   :  { %1589 = vmatpush.msrb.mxu3 %v43_v31 }
  0x28   :  { %1590 = vmatpush.msrb.mxu3 %v1763_v14 }
  0x29   :  { %1528 = vmatmul.msk.f32.gmra.mxu1 %vm58_vm1, %v1859_v45  ;;  %1505 = vmatmul.msk.f32.gmra.mxu0 %vm58_vm1, %v1859_v45 }
  0x2a   :  { %1591 = vmatpush.msrb.mxu3 %v1735_v5  ;;  %v2002_v5 = vld [vmem:[%s2961_s0 + $0x78] sm:$0xff] }
  0x2d   :  { %1524 = vmatmul.msk.f32.gmra.mxu3 %vm58_vm1, %v1869_v46 }
  0x31   :  { %1529 = vmatmul.msk.f32.gmra.mxu1 %vm58_vm1, %v1877_v47  ;;  %1506 = vmatmul.msk.f32.gmra.mxu0 %vm58_vm1, %v1877_v47 }
  0x35   :  { %1525 = vmatmul.msk.f32.gmra.mxu3 %vm58_vm1, %v1886_v48 }
  0x39   :  { %1530 = vmatmul.msk.f32.gmra.mxu1 %vm58_vm1, %v1893_v49  ;;  %1507 = vmatmul.msk.f32.gmra.mxu0 %vm58_vm1, %v1893_v49 }
  0x3d   :  { %1544 = vmatmul.msk.f32.vlgmr.msrb.gmra.mxu3 %vm58_vm1, %v1811_v37 }
  0x41   :  { %1531 = vmatmul.msk.f32.gmra.mxu1 %vm58_vm1, %v1904_v50  ;;  %1508 = vmatmul.msk.f32.gmra.mxu0 %vm58_vm1, %v1904_v50 }
  0x45   :  { %1545 = vmatmul.msk.f32.gmra.mxu3 %vm58_vm1, %v1833_v42 }
  0x49   :  { %1532 = vmatmul.msk.f32.gmra.mxu1 %vm58_vm1, %v1915_v51  ;;  %1509 = vmatmul.msk.f32.gmra.mxu0 %vm58_vm1, %v1915_v51 }
  0x4d   :  { %1546 = vmatmul.msk.f32.gmra.mxu3 %vm58_vm1, %v1852_v44 }
  0x51   :  { %1533 = vmatmul.msk.f32.gmra.mxu1 %vm58_vm1, %v1926_v52  ;;  %1510 = vmatmul.msk.f32.gmra.mxu0 %vm58_vm1, %v1926_v52 }
  0x55   :  { %1547 = vmatmul.msk.f32.gmra.mxu3 %vm58_vm1, %v1869_v46 }
  0x59   :  { %1534 = vmatmul.msk.f32.gmra.mxu1 %vm58_vm1, %v1937_v53  ;;  %1511 = vmatmul.msk.f32.gmra.mxu0 %vm58_vm1, %v1937_v53 }
  0x5d   :  { %1548 = vmatmul.msk.f32.gmra.mxu3 %vm58_vm1, %v1886_v48 }
  0x61   :  { %1535 = vmatmul.msk.f32.gmra.mxu1 %vm58_vm1, %v1948_v54  ;;  %1512 = vmatmul.msk.f32.gmra.mxu0 %vm58_vm1, %v1948_v54 }
  0x69   :  { %1536 = vmatmul.msk.f32.gmra.mxu1 %vm58_vm1, %v1957_v55  ;;  %1513 = vmatmul.msk.f32.gmra.mxu0 %vm58_vm1, %v1957_v55 }
  0x71   :  { %1537 = vmatmul.msk.f32.gmra.mxu1 %vm58_vm1, %v1966_v56  ;;  %1514 = vmatmul.msk.f32.gmra.mxu0 %vm58_vm1, %v1966_v56 }
  0x78   :  { %v340_v58 = vpop.xlane.xlu1 %339 }
  0x79   :  { %v304_v59 = vpop.xlane.xlu0 %303  ;;  %1538 = vmatmul.msk.f32.gmra.mxu1 %vm58_vm1, %v1975_v57  ;;  %1515 = vmatmul.msk.f32.gmra.mxu0 %vm58_vm1, %v1975_v57 }
  0x7a   :  { %347 = vmatpush.msra.mxu2 %v340_v58  ;;  %1592 = vmatpush.msra.mxu3 %v340_v58 }
  0x7b   :  { %v332_v60 = vpop.xlane.xlu2 %331 }
  0x80   :  { %v336_v62 = vpop.xlane.xlu1 %335 }
  0x81   :  { %v308_v63 = vpop.xlane.xlu0 %307  ;;  %348 = vmatpush.msra.mxu2 %v336_v62  ;;  %1593 = vmatpush.msra.mxu3 %v336_v62 }
  0x82   :  { %1539 = vmatmul.msk.f32.gmra.mxu1 %vm58_vm1, %v1984_v61  ;;  %1516 = vmatmul.msk.f32.gmra.mxu0 %vm58_vm1, %v1984_v61 }
  0x83   :  { %349 = vmatpush.msra.mxu2 %v332_v60  ;;  %1594 = vmatpush.msra.mxu3 %v332_v60  ;;  %v328_v0 = vpop.xlane.xlu2 %327 }
  0x85   :  { %350 = vmatpush.msra.mxu2 %v328_v0  ;;  %1595 = vmatpush.msra.mxu3 %v328_v0 }
  0x88   :  { %v320_v3 = vpop.xlane.xlu1 %319 }
  0x89   :  { %v324_v2 = vpop.xlane.xlu0 %323 }
  0x8a   :  { %351 = vmatpush.msra.mxu2 %v324_v2  ;;  %1596 = vmatpush.msra.mxu3 %v324_v2 }
  0x8b   :  { %1540 = vmatmul.msk.f32.gmra.mxu1 %vm58_vm1, %v1993_v1  ;;  %1517 = vmatmul.msk.f32.gmra.mxu0 %vm58_vm1, %v1993_v1  ;;  %v316_v4 = vpop.xlane.xlu2 %315 }
  0x8c   :  { %352 = vmatpush.msra.mxu2 %v320_v3  ;;  %1597 = vmatpush.msra.mxu3 %v320_v3 }
  0x8e   :  { %353 = vmatpush.msra.mxu2 %v316_v4  ;;  %1598 = vmatpush.msra.mxu3 %v316_v4 }
  0x91   :  { %v312_v6 = vpop.xlane.xlu0 %311 }
  0x92   :  { %354 = vmatpush.msra.mxu2 %v312_v6  ;;  %1599 = vmatpush.msra.mxu3 %v312_v6 }
  0x93   :  { %1541 = vmatmul.msk.f32.gmra.mxu1 %vm58_vm1, %v2002_v5  ;;  %1518 = vmatmul.msk.f32.gmra.mxu0 %vm58_vm1, %v2002_v5 }
  0x94   :  { %355 = vmatpush.msra.mxu2 %v308_v63  ;;  %1600 = vmatpush.msra.mxu3 %v308_v63 }
  0x96   :  { %356 = vmatpush.msra.mxu2 %v304_v59  ;;  %1601 = vmatpush.msra.mxu3 %v304_v59  ;;  %v2008_v7 = vpop.f32.mrf.mxu1  ;;  %v2010_v8 = vpop.f32.mrf.mxu0 }
  0x97   :  { %1549 = vmatmul.msk.f32.vlgmr.msra.gmra.mxu2 %vm58_vm1, %v1820_v39  ;;  %v428_v9 = vmul.f32 %v2008_v7, %v2008_v7  ;;  %v427_v10 = vmul.f32 %v2010_v8, %v2010_v8  ;;  %1567 = vmatmul.msk.f32.vlgmr.msra.gmra.mxu3 %vm58_vm1, %v1811_v37 }
  0x98   :  { %v2020_v11 = vpop.f32.mrf.mxu3 }
  0x99   :  { %v473_v13 = vsel %vm300_vm0, %v428_v9, 0.0  ;;  %v463_v59 = vmul.f32 %v2020_v11, %v2020_v11 }
  0x9a   :  { %v474_v14 = vadd.f32 %v473_v13, %v427_v10 }
  0x9b   :  { %1542 = vmatmul.msk.f32.gmra.mxu1 %vm58_vm1, %v2025_v12  ;;  %1519 = vmatmul.msk.f32.gmra.mxu0 %vm58_vm1, %v2025_v12 }
  0x9c   :  { %475 = vadd.xlane.f32.xlu1 %v474_v14 }
  0x9e   :  { %v2032_v15 = vpop.f32.mrf.mxu1  ;;  %v2034_v16 = vpop.f32.mrf.mxu0 }
  0x9f   :  { %1550 = vmatmul.msk.f32.gmra.mxu2 %vm58_vm1, %v1842_v43  ;;  %v430_v17 = vmul.f32 %v2032_v15, %v2032_v15  ;;  %v429_v18 = vmul.f32 %v2034_v16, %v2034_v16  ;;  %1568 = vmatmul.msk.f32.gmra.mxu3 %vm58_vm1, %v1833_v42 }
  0xa0   :  { %v2044_v19 = vpop.f32.mrf.mxu3 }
  0xa1   :  { %v477_v21 = vsel %vm300_vm0, %v430_v17, 0.0  ;;  %v465_v10 = vmul.f32 %v2044_v19, %v2044_v19 }
  0xa2   :  { %v478_v22 = vadd.f32 %v477_v21, %v429_v18 }
  0xa3   :  { %1543 = vmatmul.msk.f32.gmra.mxu1 %vm58_vm1, %v2049_v20  ;;  %1520 = vmatmul.msk.f32.gmra.mxu0 %vm58_vm1, %v2049_v20 }
  0xa4   :  { %479 = vadd.xlane.f32.xlu2 %v478_v22 }
  0xa6   :  { %v2056_v23 = vpop.f32.mrf.mxu1  ;;  %v2058_v24 = vpop.f32.mrf.mxu0 }
  0xa7   :  { %1551 = vmatmul.msk.f32.gmra.mxu2 %vm58_vm1, %v1859_v45  ;;  %v432_v25 = vmul.f32 %v2056_v23, %v2056_v23  ;;  %v431_v26 = vmul.f32 %v2058_v24, %v2058_v24  ;;  %1569 = vmatmul.msk.f32.gmra.mxu3 %vm58_vm1, %v1852_v44 }
  0xa8   :  { %v2068_v27 = vpop.f32.mrf.mxu3 }
  0xa9   :  { %2996 = vst [vmem:[#allocation5_spill] sm:$0xff] %v2068_v27  ;;  %v481_v28 = vsel %vm300_vm0, %v432_v25, 0.0 }
  0xaa   :  { %v482_v29 = vadd.f32 %v481_v28, %v431_v26 }
  0xac   :  { %483 = vadd.xlane.f32.xlu0 %v482_v29  ;;  %v467_v29 = vmul.f32 %v2068_v27, %v2068_v27 }
  0xae   :  { %v2071_v30 = vpop.f32.mrf.mxu1  ;;  %v2073_v31 = vpop.f32.mrf.mxu0 }
  0xaf   :  { %1552 = vmatmul.msk.f32.gmra.mxu2 %vm58_vm1, %v1877_v47  ;;  %v434_v32 = vmul.f32 %v2071_v30, %v2071_v30  ;;  %v433_v33 = vmul.f32 %v2073_v31, %v2073_v31  ;;  %1570 = vmatmul.msk.f32.gmra.mxu3 %vm58_vm1, %v1869_v46 }
  0xb0   :  { %v2083_v34 = vpop.f32.mrf.mxu3 }
  0xb1   :  { %2997 = vst [vmem:[#allocation6_spill] sm:$0xff] %v2083_v34  ;;  %v485_v35 = vsel %vm300_vm0, %v434_v32, 0.0 }
  0xb2   :  { %v486_v36 = vadd.f32 %v485_v35, %v433_v33 }
  0xb4   :  { %487 = vadd.xlane.f32.xlu1 %v486_v36 }
  0xb6   :  { %v2086_v37 = vpop.f32.mrf.mxu1  ;;  %v2088_v38 = vpop.f32.mrf.mxu0 }
  0xb7   :  { %1553 = vmatmul.msk.f32.gmra.mxu2 %vm58_vm1, %v1893_v49  ;;  %v436_v39 = vmul.f32 %v2086_v37, %v2086_v37  ;;  %v435_v40 = vmul.f32 %v2088_v38, %v2088_v38  ;;  %1571 = vmatmul.msk.f32.gmra.mxu3 %vm58_vm1, %v1886_v48 }
  0xb8   :  { %v2098_v41 = vpop.f32.mrf.mxu3 }
  0xb9   :  { %2998 = vst [vmem:[#allocation7_spill] sm:$0xff] %v2098_v41  ;;  %v489_v42 = vsel %vm300_vm0, %v436_v39, 0.0 }
  0xba   :  { %v490_v43 = vadd.f32 %v489_v42, %v435_v40 }
  0xbc   :  { %491 = vadd.xlane.f32.xlu2 %v490_v43 }
  0xbe   :  { %v2101_v44 = vpop.f32.mrf.mxu1  ;;  %v2103_v45 = vpop.f32.mrf.mxu0 }
  0xbf   :  { %2999 = vst [vmem:[#allocation8_spill] sm:$0xff] %v2101_v44  ;;  %1554 = vmatmul.msk.f32.gmra.mxu2 %vm58_vm1, %v1904_v50  ;;  %v438_v46 = vmul.f32 %v2101_v44, %v2101_v44  ;;  %v437_v47 = vmul.f32 %v2103_v45, %v2103_v45 }
  0xc0   :  { %3000 = vst [vmem:[#allocation9_spill] sm:$0xff] %v2103_v45  ;;  %v2111_v48 = vpop.f32.mrf.mxu3 }
  0xc1   :  { %v464_v49 = vmul.f32 %v2111_v48, %v2111_v48  ;;  %v493_v58 = vsel %vm300_vm0, %v438_v46, 0.0 }
  0xc2   :  { %v494_v60 = vadd.f32 %v493_v58, %v437_v47  ;;  %v469_v47 = vmul.f32 %v2083_v34, %v2083_v34 }
  0xc3   :  { %v545_v62 = vsel %vm300_vm0, %v464_v49, 0.0 }
  0xc4   :  { %v546_v50 = vadd.f32 %v545_v62, %v463_v59  ;;  %495 = vadd.xlane.f32.xlu0 %v494_v60 }
  0xc6   :  { %547 = vadd.xlane.f32.xlu1 %v546_v50  ;;  %v2119_v63 = vpop.f32.mrf.mxu1  ;;  %v2121_v0 = vpop.f32.mrf.mxu0 }
  0xc7   :  { %3001 = vst [vmem:[#allocation10_spill] sm:$0xff] %v2119_v63  ;;  %1555 = vmatmul.msk.f32.gmra.mxu2 %vm58_vm1, %v1915_v51  ;;  %v440_v2 = vmul.f32 %v2119_v63, %v2119_v63  ;;  %v439_v3 = vmul.f32 %v2121_v0, %v2121_v0 }
  0xc8   :  { %3002 = vst [vmem:[#allocation11_spill] sm:$0xff] %v2121_v0  ;;  %v2129_v4 = vpop.f32.mrf.mxu3 }
  0xc9   :  { %v466_v6 = vmul.f32 %v2129_v4, %v2129_v4  ;;  %v497_v9 = vsel %vm300_vm0, %v440_v2, 0.0 }
  0xca   :  { %v498_v13 = vadd.f32 %v497_v9, %v439_v3  ;;  %v471_v9 = vmul.f32 %v2098_v41, %v2098_v41 }
  0xcb   :  { %v549_v14 = vsel %vm300_vm0, %v466_v6, 0.0 }
  0xcc   :  { %v550_v51 = vadd.f32 %v549_v14, %v465_v10 }
  0xce   :  { %551 = vadd.xlane.f32.xlu2 %v550_v51  ;;  %v2137_v17 = vpop.f32.mrf.mxu1  ;;  %v2139_v18 = vpop.f32.mrf.mxu0  ;;  %499 = vadd.xlane.f32.xlu1 %v498_v13 }
  0xcf   :  { %1556 = vmatmul.msk.f32.gmra.mxu2 %vm58_vm1, %v1926_v52  ;;  %v442_v21 = vmul.f32 %v2137_v17, %v2137_v17  ;;  %v441_v22 = vmul.f32 %v2139_v18, %v2139_v18 }
  0xd0   :  { %v2147_v25 = vpop.f32.mrf.mxu3 }
  0xd1   :  { %3003 = vst [vmem:[#allocation12_spill] sm:$0xff] %v2147_v25  ;;  %v468_v26 = vmul.f32 %v2147_v25, %v2147_v25  ;;  %v501_v28 = vsel %vm300_vm0, %v442_v21, 0.0 }
  0xd2   :  { %v502_v32 = vadd.f32 %v501_v28, %v441_v22 }
  0xd3   :  { %v553_v33 = vsel %vm300_vm0, %v468_v26, 0.0 }
  0xd4   :  { %v554_v52 = vadd.f32 %v553_v33, %v467_v29 }
  0xd6   :  { %555 = vadd.xlane.f32.xlu0 %v554_v52  ;;  %v2155_v35 = vpop.f32.mrf.mxu1  ;;  %v2157_v36 = vpop.f32.mrf.mxu0  ;;  %503 = vadd.xlane.f32.xlu2 %v502_v32 }
  0xd7   :  { %3004 = vst [vmem:[#allocation13_spill] sm:$0xff] %v2155_v35  ;;  %1557 = vmatmul.msk.f32.gmra.mxu2 %vm58_vm1, %v1937_v53  ;;  %v444_v39 = vmul.f32 %v2155_v35, %v2155_v35  ;;  %v443_v40 = vmul.f32 %v2157_v36, %v2157_v36 }
  0xd8   :  { %3005 = vst [vmem:[#allocation14_spill] sm:$0xff] %v2157_v36  ;;  %v2165_v42 = vpop.f32.mrf.mxu3 }
  0xd9   :  { %3006 = vst [vmem:[#allocation15_spill] sm:$0xff] %v2165_v42  ;;  %v470_v43 = vmul.f32 %v2165_v42, %v2165_v42  ;;  %v505_v46 = vsel %vm300_vm0, %v444_v39, 0.0 }
  0xda   :  { %v506_v49 = vadd.f32 %v505_v46, %v443_v40 }
  0xdb   :  { %v557_v58 = vsel %vm300_vm0, %v470_v43, 0.0 }
  0xdc   :  { %v558_v53 = vadd.f32 %v557_v58, %v469_v47 }
  0xde   :  { %559 = vadd.xlane.f32.xlu1 %v558_v53  ;;  %v2173_v59 = vpop.f32.mrf.mxu1  ;;  %v2175_v60 = vpop.f32.mrf.mxu0  ;;  %507 = vadd.xlane.f32.xlu0 %v506_v49 }
  0xdf   :  { %3007 = vst [vmem:[#allocation16_spill] sm:$0xff] %v2173_v59  ;;  %1558 = vmatmul.msk.f32.gmra.mxu2 %vm58_vm1, %v1948_v54  ;;  %v446_v62 = vmul.f32 %v2173_v59, %v2173_v59  ;;  %v445_v50 = vmul.f32 %v2175_v60, %v2175_v60 }
  0xe0   :  { %3008 = vst [vmem:[#allocation17_spill] sm:$0xff] %v2175_v60  ;;  %v2183_v2 = vpop.f32.mrf.mxu3 }
  0xe1   :  { %3009 = vst [vmem:[#allocation18_spill] sm:$0xff] %v2183_v2  ;;  %v472_v3 = vmul.f32 %v2183_v2, %v2183_v2  ;;  %v509_v6 = vsel %vm300_vm0, %v446_v62, 0.0 }
  0xe2   :  { %v510_v10 = vadd.f32 %v509_v6, %v445_v50 }
  0xe3   :  { %v561_v13 = vsel %vm300_vm0, %v472_v3, 0.0 }
  0xe4   :  { %v562_v54 = vadd.f32 %v561_v13, %v471_v9 }
  0xe6   :  { %563 = vadd.xlane.f32.xlu2 %v562_v54  ;;  %v2191_v14 = vpop.f32.mrf.mxu1  ;;  %v2193_v51 = vpop.f32.mrf.mxu0  ;;  %511 = vadd.xlane.f32.xlu1 %v510_v10 }
  0xe7   :  { %3010 = vst [vmem:[#allocation19_spill] sm:$0xff] %v2191_v14  ;;  %1559 = vmatmul.msk.f32.gmra.mxu2 %vm58_vm1, %v1957_v55  ;;  %v448_v21 = vmul.f32 %v2191_v14, %v2191_v14  ;;  %v447_v22 = vmul.f32 %v2193_v51, %v2193_v51 }
  0xe8   :  { %3011 = vst [vmem:[#allocation20_spill] sm:$0xff] %v2193_v51 }
  0xe9   :  { %v513_v26 = vsel %vm300_vm0, %v448_v21, 0.0 }
  0xea   :  { %v514_v28 = vadd.f32 %v513_v26, %v447_v22 }
  0xee   :  { %v2202_v29 = vpop.f32.mrf.mxu1  ;;  %v2204_v32 = vpop.f32.mrf.mxu0  ;;  %515 = vadd.xlane.f32.xlu2 %v514_v28 }
  0xef   :  { %3012 = vst [vmem:[#allocation21_spill] sm:$0xff] %v2202_v29  ;;  %1560 = vmatmul.msk.f32.gmra.mxu2 %vm58_vm1, %v1966_v56  ;;  %v450_v55 = vmul.f32 %v2202_v29, %v2202_v29  ;;  %v449_v33 = vmul.f32 %v2204_v32, %v2204_v32 }
  0xf0   :  { %3013 = vst [vmem:[#allocation22_spill] sm:$0xff] %v2204_v32 }
  0xf1   :  { %v517_v52 = vsel %vm300_vm0, %v450_v55, 0.0 }
  0xf2   :  { %v518_v39 = vadd.f32 %v517_v52, %v449_v33 }
  0xf4   :  { %519 = vadd.xlane.f32.xlu0 %v518_v39  ;;  %v2965_v39 = vmov 0  }
  0xf5   :  { %1608 = vset.pattern.permute.xlu1 %v2965_v39  ;;  %1609 = vset.pattern.permute.xlu0 %v2965_v39 }
  0xf6   :  { %v2213_v40 = vpop.f32.mrf.mxu1  ;;  %v2215_v43 = vpop.f32.mrf.mxu0  ;;  %1610 = vset.pattern.permute.xlu2 %v2965_v39 }
  0xf7   :  { %3014 = vst [vmem:[#allocation23_spill] sm:$0xff] %v2213_v40  ;;  %1561 = vmatmul.msk.f32.gmra.mxu2 %vm58_vm1, %v1975_v57  ;;  %v452_v56 = vmul.f32 %v2213_v40, %v2213_v40  ;;  %v451_v46 = vmul.f32 %v2215_v43, %v2215_v43 }
  0xf8   :  { %3015 = vst [vmem:[#allocation24_spill] sm:$0xff] %v2215_v43 }
  0xf9   :  { %v521_v47 = vsel %vm300_vm0, %v452_v56, 0.0 }
  0xfa   :  { %v522_v49 = vadd.f32 %v521_v47, %v451_v46 }
  0xfc   :  { %523 = vadd.xlane.f32.xlu1 %v522_v49 }
  0xff   :  { %1562 = vmatmul.msk.f32.gmra.mxu2 %vm58_vm1, %v1984_v61  ;;  %v2226_v58 = vpop.f32.mrf.mxu1  ;;  %v2228_v53 = vpop.f32.mrf.mxu0 }
 0x100   :  { %3016 = vst [vmem:[#allocation25_spill] sm:$0xff] %v2226_v58  ;;  %v454_v57 = vmul.f32 %v2226_v58, %v2226_v58  ;;  %v453_v62 = vmul.f32 %v2228_v53, %v2228_v53 }
 0x101   :  { %3017 = vst [vmem:[#allocation26_spill] sm:$0xff] %v2228_v53 }
 0x102   :  { %v525_v50 = vsel %vm300_vm0, %v454_v57, 0.0 }
 0x103   :  { %v526_v3 = vadd.f32 %v525_v50, %v453_v62 }
 0x105   :  { %527 = vadd.xlane.f32.xlu2 %v526_v3 }
 0x107   :  { %1563 = vmatmul.msk.f32.gmra.mxu2 %vm58_vm1, %v1993_v1 }
 0x108   :  { %v2237_v6 = vpop.f32.mrf.mxu1  ;;  %v2239_v61 = vpop.f32.mrf.mxu0 }
 0x109   :  { %3018 = vst [vmem:[#allocation27_spill] sm:$0xff] %v2237_v6  ;;  %v456_v9 = vmul.f32 %v2237_v6, %v2237_v6  ;;  %v455_v10 = vmul.f32 %v2239_v61, %v2239_v61 }
 0x10a   :  { %3019 = vst [vmem:[#allocation28_spill] sm:$0xff] %v2239_v61 }
 0x10b   :  { %v529_v13 = vsel %vm300_vm0, %v456_v9, 0.0 }
 0x10c   :  { %v530_v54 = vadd.f32 %v529_v13, %v455_v10 }
 0x10e   :  { %531 = vadd.xlane.f32.xlu0 %v530_v54 }
 0x10f   :  { %1564 = vmatmul.msk.f32.gmra.mxu2 %vm58_vm1, %v2002_v5  ;;  %v476_v33 = vpop.xlane.xlu1 %475 }
 0x110   :  { %v2248_v21 = vpop.f32.mrf.mxu1  ;;  %v2250_v1 = vpop.f32.mrf.mxu0  ;;  %v588_v49 = vmul.f32 0.0051020407, %v476_v33 }
 0x111   :  { %3020 = vst [vmem:[#allocation29_spill] sm:$0xff] %v2248_v21  ;;  %v458_v22 = vmul.f32 %v2248_v21, %v2248_v21  ;;  %v457_v26 = vmul.f32 %v2250_v1, %v2250_v1 }
 0x112   :  { %3021 = vst [vmem:[#allocation30_spill] sm:$0xff] %v2250_v1 }
 0x113   :  { %v533_v28 = vsel %vm300_vm0, %v458_v22, 0.0 }
 0x114   :  { %v534_v55 = vadd.f32 %v533_v28, %v457_v26 }
 0x116   :  { %535 = vadd.xlane.f32.xlu1 %v534_v55 }
 0x117   :  { %1565 = vmatmul.msk.f32.gmra.mxu2 %vm58_vm1, %v2025_v12  ;;  %v480_v9 = vpop.xlane.xlu2 %479 }
 0x118   :  { %v2259_v52 = vpop.f32.mrf.mxu1  ;;  %v2261_v5 = vpop.f32.mrf.mxu0  ;;  %v589_v55 = vmul.f32 0.0051020407, %v480_v9 }
 0x119   :  { %3022 = vst [vmem:[#allocation31_spill] sm:$0xff] %v2259_v52  ;;  %v460_v56 = vmul.f32 %v2259_v52, %v2259_v52  ;;  %v459_v46 = vmul.f32 %v2261_v5, %v2261_v5 }
 0x11a   :  { %3023 = vst [vmem:[#allocation32_spill] sm:$0xff] %v2261_v5  ;;  %v358_v47 = vpop.f32.mrf.mxu2 }
 0x11b   :  { %v2270_v12 = vmul.f32 0.0051020407, %v358_v47  ;;  %v537_v57 = vsel %vm300_vm0, %v460_v56, 0.0 }
 0x11c   :  { %v538_v62 = vadd.f32 %v537_v57, %v459_v46 }
 0x11d   :  { %v611_v50 = vmul.f32 %v2270_v12, %v2270_v12 }
 0x11e   :  { %539 = vadd.xlane.f32.xlu2 %v538_v62 }
 0x11f   :  { %v634_v3 = vsub.f32 %v588_v49, %v611_v50  ;;  %1566 = vmatmul.msk.f32.gmra.mxu2 %vm58_vm1, %v2049_v20  ;;  %v412_v20 = vpop.f32.mrf.mxu3  ;;  %v484_v62 = vpop.xlane.xlu0 %483 }
 0x120   :  { %v2277_v10 = vpop.f32.mrf.mxu1  ;;  %v2279_v13 = vpop.f32.mrf.mxu0  ;;  %v590_v9 = vmul.f32 0.0051020407, %v484_v62  ;;  %v2298_v34 = vmul.f32 0.0051020407, %v412_v20 }
 0x121   :  { %3024 = vst [vmem:[#allocation33_spill] sm:$0xff] %v2277_v10  ;;  %v657_v54 = vmax.f32 %v634_v3, 0.0  ;;  %v462_v22 = vmul.f32 %v2277_v10, %v2277_v10  ;;  %v461_v26 = vmul.f32 %v2279_v13, %v2279_v13 }
 0x122   :  { %3025 = vst [vmem:[#allocation34_spill] sm:$0xff] %v2279_v13  ;;  %v361_v28 = vpop.f32.mrf.mxu2 }
 0x123   :  { %v703_v33 = vadd.f32 0.001, %v657_v54  ;;  %v2285_v56 = vmul.f32 0.0051020407, %v361_v28  ;;  %v541_v46 = vsel %vm300_vm0, %v462_v22, 0.0 }
 0x124   :  { %v542_v47 = vadd.f32 %v541_v46, %v461_v26 }
 0x125   :  { %1616 = vrsqrt.f32 %v703_v33  ;;  %v612_v49 = vmul.f32 %v2285_v56, %v2285_v56  ;;  %vm732_vm3 = vweird.f32 %v703_v33 }
 0x126   :  { %543 = vadd.xlane.f32.xlu0 %v542_v47 }
 0x127   :  { %v635_v57 = vsub.f32 %v589_v55, %v612_v49  ;;  %v415_v26 = vpop.f32.mrf.mxu3  ;;  %v488_v10 = vpop.xlane.xlu1 %487 }
 0x128   :  { %v591_v62 = vmul.f32 0.0051020407, %v488_v10 }
 0x129   :  { %v658_v50 = vmax.f32 %v635_v57, 0.0 }
 0x12a   :  { %v364_v3 = vpop.f32.mrf.mxu2 }
 0x12b   :  { %v1617_v39 = vpop.eup %1616  ;;  %v704_v25 = vadd.f32 0.001, %v658_v50  ;;  %v2290_v27 = vmul.f32 0.0051020407, %v364_v3 }
 0x12c   :  { %v727_v54 = vmul.f32 %v1617_v39, %v703_v33  ;;  %vm733_vm2 = vweird.f32 %v1617_v39 }
 0x12d   :  { %1618 = vrsqrt.f32 %v704_v25  ;;  %v613_v22 = vmul.f32 %v2290_v27, %v2290_v27  ;;  %vm734_vm4 = vmor %vm732_vm3, %vm733_vm2  ;;  %vm742_vm6 = vweird.f32 %v704_v25 }
 0x12e   :  { %v728_v28 = vmul.f32 %v1617_v39, %v727_v54 }
 0x12f   :  { %v636_v46 = vsub.f32 %v590_v9, %v613_v22  ;;  %v2303_v9 = vld [vmem:[%s2963_s2] sm:$0xff]  ;;  %v492_v33 = vpop.xlane.xlu2 %491  ;;  %v418_v20 = vpop.f32.mrf.mxu3 }
 0x130   :  { %v729_v13 = vmul.f32 0.5, %v728_v28  ;;  %v2335_v29 = vmul.f32 0.0051020407, %v418_v20 }
 0x131   :  { %v659_v47 = vmax.f32 %v636_v46, 0.0 }
 0x132   :  { %v730_v55 = vsub.f32 1.5, %v729_v13  ;;  %v367_v49 = vpop.f32.mrf.mxu2 }
 0x133   :  { %v1619_v57 = vpop.eup %1618  ;;  %v2294_v42 = vadd.f32 0.001, %v659_v47  ;;  %v2296_v50 = vmul.f32 0.0051020407, %v367_v49  ;;  %v629_v49 = vmul.f32 %v2298_v34, %v2298_v34 }
 0x134   :  { %v737_v3 = vmul.f32 %v1619_v57, %v704_v25  ;;  %v731_v54 = vmul.f32 %v1617_v39, %v730_v55  ;;  %vm743_vm5 = vweird.f32 %v1619_v57 }
 0x135   :  { %1620 = vrsqrt.f32 %v2294_v42  ;;  %v614_v13 = vmul.f32 %v2296_v50, %v2296_v50  ;;  %vm744_vm7 = vmor %vm742_vm6, %vm743_vm5  ;;  %vm752_vm9 = vweird.f32 %v2294_v42 }
 0x136   :  { %v738_v22 = vmul.f32 %v1619_v57, %v737_v3  ;;  %v735_v28 = vsel %vm734_vm4, %v1617_v39, %v731_v54  ;;  %v2312_v3 = vmul.f32 0.0051020407, %v415_v26 }
 0x137   :  { %v637_v46 = vsub.f32 %v591_v62, %v614_v13  ;;  %v956_v10 = vmul.f32 %v735_v28, %v2303_v9  ;;  %v592_v13 = vmul.f32 0.0051020407, %v492_v33  ;;  %v421_v2 = vpop.f32.mrf.mxu3 }
 0x138   :  { %v739_v47 = vmul.f32 0.5, %v738_v22 }
 0x139   :  { %v660_v21 = vmax.f32 %v637_v46, 0.0  ;;  %1119 = vperm.xlu1 %1608, %v956_v10   ;;  %v548_v55 = vpop.xlane.xlu1 %547  ;;  %v979_v1 = vmul.f32 %v956_v10, %v2270_v12  ;;  %v2323_v12 = vld [vmem:[%s2963_s2 + $0x8] sm:$0xff]  ;;  %v496_v10 = vpop.xlane.xlu0 %495 }
 0x13a   :  { %v740_v6 = vsub.f32 1.5, %v739_v47  ;;  %v370_v61 = vpop.f32.mrf.mxu2  ;;  %v606_v40 = vmul.f32 0.0051020407, %v548_v55 }
 0x13b   :  { %v1621_v39 = vpop.eup %1620  ;;  %v2314_v62 = vadd.f32 0.001, %v660_v21  ;;  %v2316_v54 = vmul.f32 0.0051020407, %v370_v61  ;;  %1025 = vrot.lane.b32.xlu0 %v979_v1, %s1689_s16 }
 0x13c   :  { %v747_v22 = vmul.f32 %v1621_v39, %v2294_v42  ;;  %v652_v28 = vsub.f32 %v606_v40, %v629_v49  ;;  %v741_v26 = vmul.f32 %v1619_v57, %v740_v6  ;;  %v630_v6 = vmul.f32 %v2312_v3, %v2312_v3 }
 0x13d   :  { %1622 = vrsqrt.f32 %v2314_v62  ;;  %v615_v61 = vmul.f32 %v2316_v54, %v2316_v54  ;;  %vm753_vm8 = vweird.f32 %v1621_v39  ;;  %vm762_vm12 = vweird.f32 %v2314_v62 }
 0x13e   :  { %v748_v21 = vmul.f32 %v1621_v39, %v747_v22  ;;  %v675_v46 = vmax.f32 %v652_v28, 0.0  ;;  %v745_v1 = vsel %vm744_vm7, %v1619_v57, %v741_v26  ;;  %vm754_vm10 = vmor %vm752_vm9, %vm753_vm8 }
 0x13f   :  { %v638_v25 = vsub.f32 %v592_v13, %v615_v61  ;;  %v957_v40 = vmul.f32 %v745_v1, %v2323_v12 }
 0x140   :  { %v749_v33 = vmul.f32 0.5, %v748_v21  ;;  %v2330_v47 = vadd.f32 0.001, %v675_v46  ;;  %v593_v21 = vmul.f32 0.0051020407, %v496_v10  ;;  %v2348_v46 = vld [vmem:[%s2963_s2 + $0x10] sm:$0xff] }
 0x141   :  { %v661_v49 = vmax.f32 %v638_v25, 0.0  ;;  %v552_v55 = vpop.xlane.xlu2 %551  ;;  %v980_v43 = vmul.f32 %v957_v40, %v2285_v56 }
 0x142   :  { %v750_v22 = vsub.f32 1.5, %v749_v33  ;;  %1624 = vrsqrt.f32 %v2330_v47  ;;  %v373_v57 = vpop.f32.mrf.mxu2  ;;  %v607_v13 = vmul.f32 0.0051020407, %v552_v55  ;;  %vm912_vm14 = vweird.f32 %v2330_v47 }
 0x143   :  { %v1623_v28 = vpop.eup %1622  ;;  %v2338_v26 = vadd.f32 0.001, %v661_v49  ;;  %v2340_v61 = vmul.f32 0.0051020407, %v373_v57  ;;  %1027 = vrot.lane.b32.xlu1 %v980_v43, %s1689_s16  ;;  %1124 = vperm.xlu0 %1609, %v957_v40   ;;  %v500_v49 = vpop.xlane.xlu1 %499 }
 0x144   :  { %v757_v56 = vmul.f32 %v1623_v28, %v2314_v62  ;;  %v653_v20 = vsub.f32 %v607_v13, %v630_v6  ;;  %v751_v1 = vmul.f32 %v1621_v39, %v750_v22  ;;  %v631_v22 = vmul.f32 %v2335_v29, %v2335_v29 }
 0x145   :  { %1626 = vrsqrt.f32 %v2338_v26  ;;  %v616_v25 = vmul.f32 %v2340_v61, %v2340_v61  ;;  %vm763_vm11 = vweird.f32 %v1623_v28  ;;  %v594_v32 = vmul.f32 0.0051020407, %v500_v49 }
 0x146   :  { %v758_v10 = vmul.f32 %v1623_v28, %v757_v56  ;;  %v676_v43 = vmax.f32 %v653_v20, 0.0  ;;  %v755_v40 = vsel %vm754_vm10, %v1621_v39, %v751_v1  ;;  %v2362_v20 = vmul.f32 0.0051020407, %v421_v2  ;;  %vm764_vm13 = vmor %vm762_vm12, %vm763_vm11 }
 0x147   :  { %v639_v33 = vsub.f32 %v593_v21, %v616_v25  ;;  %v958_v42 = vmul.f32 %v755_v40, %v2348_v46  ;;  %vm772_vm2 = vweird.f32 %v2338_v26 }
 0x148   :  { %v2354_v6 = vpop.eup %1624  ;;  %v759_v55 = vmul.f32 0.5, %v758_v10  ;;  %v2356_v57 = vadd.f32 0.001, %v676_v43  ;;  %v632_v49 = vmul.f32 %v2362_v20, %v2362_v20 }
 0x149   :  { %v907_v13 = vmul.f32 %v2354_v6, %v2330_v47  ;;  %v662_v41 = vmax.f32 %v639_v33, 0.0  ;;  %1129 = vperm.xlu2 %1610, %v958_v42   ;;  %v556_v56 = vpop.xlane.xlu0 %555  ;;  %v424_v33 = vpop.f32.mrf.mxu3  ;;  %vm913_vm15 = vweird.f32 %v2354_v6  ;;  %v2435_v47 = vld [vmem:[%s2963_s2 + $0x90] sm:$0xff] }
 0x14a   :  { %v760_v39 = vsub.f32 1.5, %v759_v55  ;;  %1628 = vrsqrt.f32 %v2356_v57  ;;  %v376_v21 = vpop.f32.mrf.mxu2  ;;  %v608_v1 = vmul.f32 0.0051020407, %v556_v56  ;;  %v2378_v56 = vld [vmem:[%s2963_s2 + $0x18] sm:$0xff]  ;;  %v504_v5 = vpop.xlane.xlu2 %503  ;;  %vm2422_vm3 = vmor %vm912_vm14, %vm913_vm15  ;;  %vm922_vm9 = vweird.f32 %v2356_v57 }
 0x14b   :  { %v2365_v25 = vpop.eup %1626  ;;  %v908_v10 = vmul.f32 %v2354_v6, %v907_v13  ;;  %v2368_v43 = vadd.f32 0.001, %v662_v41  ;;  %v2370_v40 = vmul.f32 0.0051020407, %v376_v21  ;;  %v2387_v21 = vmul.f32 0.0051020407, %v424_v33 }
 0x14c   :  { %v767_v2 = vmul.f32 %v2365_v25, %v2338_v26  ;;  %v654_v55 = vsub.f32 %v608_v1, %v631_v22  ;;  %v761_v59 = vmul.f32 %v1623_v28, %v760_v39  ;;  %vm773_vm1 = vweird.f32 %v2365_v25 }
 0x14d   :  { %v909_v60 = vmul.f32 0.5, %v908_v10  ;;  %1630 = vrsqrt.f32 %v2368_v43  ;;  %v617_v41 = vmul.f32 %v2370_v40, %v2370_v40  ;;  %v981_v10 = vmul.f32 %v958_v42, %v2290_v27  ;;  %vm774_vm4 = vmor %vm772_vm2, %vm773_vm1 }
 0x14e   :  { %v768_v62 = vmul.f32 %v2365_v25, %v767_v2  ;;  %v677_v22 = vmax.f32 %v654_v55, 0.0  ;;  %v765_v13 = vsel %vm764_vm13, %v1623_v28, %v761_v59  ;;  %vm782_vm6 = vweird.f32 %v2368_v43 }
 0x14f   :  { %v910_v1 = vsub.f32 1.5, %v909_v60  ;;  %v640_v52 = vsub.f32 %v594_v32, %v617_v41  ;;  %v959_v39 = vmul.f32 %v765_v13, %v2378_v56  ;;  %v2415_v13 = vld [vmem:[%s2963_s2 + $0x20] sm:$0xff] }
 0x150   :  { %v2391_v35 = vpop.eup %1628  ;;  %v769_v36 = vmul.f32 0.5, %v768_v62  ;;  %v2394_v58 = vadd.f32 0.001, %v677_v22  ;;  %v595_v22 = vmul.f32 0.0051020407, %v504_v5 }
 0x151   :  { %v917_v59 = vmul.f32 %v2391_v35, %v2356_v57  ;;  %v663_v28 = vmax.f32 %v640_v52, 0.0  ;;  %1134 = vperm.xlu1 %1608, %v959_v39   ;;  %1029 = vrot.lane.b32.xlu2 %v981_v10, %s1689_s16  ;;  %v560_v60 = vpop.xlane.xlu1 %559  ;;  %v982_v27 = vmul.f32 %v959_v39, %v2296_v50  ;;  %v911_v2 = vmul.f32 %v2354_v6, %v910_v1 }
 0x152   :  { %v770_v32 = vsub.f32 1.5, %v769_v36  ;;  %1632 = vrsqrt.f32 %v2394_v58  ;;  %v379_v42 = vpop.f32.mrf.mxu2  ;;  %v609_v33 = vmul.f32 0.0051020407, %v560_v60  ;;  %vm923_vm8 = vweird.f32 %v2391_v35 }
 0x153   :  { %v1631_v55 = vpop.eup %1630  ;;  %v918_v41 = vmul.f32 %v2391_v35, %v917_v59  ;;  %v2405_v62 = vadd.f32 0.001, %v663_v28  ;;  %v2407_v52 = vmul.f32 0.0051020407, %v379_v42  ;;  %1031 = vrot.lane.b32.xlu0 %v982_v27, %s1689_s16  ;;  %v508_v59 = vpop.xlane.xlu0 %507  ;;  %v915_v28 = vsel %vm2422_vm3, %v2354_v6, %v911_v2  ;;  %vm2496_vm12 = vmor %vm922_vm9, %vm923_vm8 }
 0x154   :  { %v777_v36 = vmul.f32 %v1631_v55, %v2368_v43  ;;  %v655_v50 = vsub.f32 %v609_v33, %v632_v49  ;;  %v771_v1 = vmul.f32 %v2365_v25, %v770_v32  ;;  %v596_v5 = vmul.f32 0.0051020407, %v508_v59 }
 0x155   :  { %1634 = vrsqrt.f32 %v2405_v62  ;;  %v618_v26 = vmul.f32 %v2407_v52, %v2407_v52  ;;  %v919_v60 = vmul.f32 0.5, %v918_v41  ;;  %v974_v6 = vmul.f32 %v915_v28, %v2435_v47 }
 0x156   :  { %v778_v49 = vmul.f32 %v1631_v55, %v777_v36  ;;  %v678_v39 = vmax.f32 %v655_v50, 0.0  ;;  %v775_v10 = vsel %vm774_vm4, %v2365_v25, %v771_v1  ;;  %v633_v25 = vmul.f32 %v2387_v21, %v2387_v21 }
 0x157   :  { %v641_v27 = vsub.f32 %v595_v22, %v618_v26  ;;  %v960_v32 = vmul.f32 %v775_v10, %v2415_v13  ;;  %vm783_vm5 = vweird.f32 %v1631_v55  ;;  %vm792_vm11 = vweird.f32 %v2405_v62 }
 0x158   :  { %v2441_v42 = vpop.eup %1632  ;;  %v779_v33 = vmul.f32 0.5, %v778_v49  ;;  %v2443_v36 = vadd.f32 0.001, %v678_v39  ;;  %v920_v49 = vsub.f32 1.5, %v919_v60  ;;  %vm784_vm7 = vmor %vm782_vm6, %vm783_vm5  ;;  %vm932_vm15 = vweird.f32 %v2394_v58 }
 0x159   :  { %v927_v50 = vmul.f32 %v2441_v42, %v2394_v58  ;;  %v664_v1 = vmax.f32 %v641_v27, 0.0  ;;  %1139 = vperm.xlu2 %1610, %v960_v32   ;;  %v564_v53 = vpop.xlane.xlu2 %563  ;;  %vm933_vm14 = vweird.f32 %v2441_v42 }
 0x15a   :  { %v780_v2 = vsub.f32 1.5, %v779_v33  ;;  %1636 = vrsqrt.f32 %v2443_v36  ;;  %v382_v41 = vpop.f32.mrf.mxu2  ;;  %v610_v22 = vmul.f32 0.0051020407, %v564_v53  ;;  %v2464_v53 = vld [vmem:[%s2963_s2 + $0x28] sm:$0xff]  ;;  %v921_v51 = vmul.f32 %v2391_v35, %v920_v49  ;;  %vm934_vm1 = vmor %vm932_vm15, %vm933_vm14 }
 0x15b   :  { %v2451_v26 = vpop.eup %1634  ;;  %v2454_v39 = vadd.f32 0.001, %v664_v1  ;;  %v2456_v10 = vmul.f32 0.0051020407, %v382_v41  ;;  %1209 = vperm.xlu0 %1609, %v974_v6   ;;  %v928_v59 = vmul.f32 %v2441_v42, %v927_v50  ;;  %vm942_vm5 = vweird.f32 %v2443_v36 }
 0x15c   :  { %v787_v28 = vmul.f32 %v2451_v26, %v2405_v62  ;;  %v656_v27 = vsub.f32 %v610_v22, %v633_v25  ;;  %v781_v33 = vmul.f32 %v1631_v55, %v780_v2  ;;  %v983_v25 = vmul.f32 %v960_v32, %v2316_v54  ;;  %v512_v22 = vpop.xlane.xlu1 %511 }
 0x15d   :  { %1638 = vrsqrt.f32 %v2454_v39  ;;  %v619_v43 = vmul.f32 %v2456_v10, %v2456_v10  ;;  %v929_v14 = vmul.f32 0.5, %v928_v59  ;;  %vm793_vm10 = vweird.f32 %v2451_v26 }
 0x15e   :  { %v788_v60 = vmul.f32 %v2451_v26, %v787_v28  ;;  %v785_v1 = vsel %vm784_vm7, %v1631_v55, %v781_v33  ;;  %v679_v50 = vmax.f32 %v656_v27, 0.0  ;;  %v997_v55 = vmul.f32 %v974_v6, %v2298_v34  ;;  %vm2516_vm13 = vmor %vm792_vm11, %vm793_vm10 }
 0x15f   :  { %v642_v41 = vsub.f32 %v596_v5, %v619_v43  ;;  %v961_v63 = vmul.f32 %v785_v1, %v2464_v53  ;;  %v597_v28 = vmul.f32 0.0051020407, %v512_v22  ;;  %v930_v6 = vsub.f32 1.5, %v929_v14 }
 0x160   :  { %v2472_v0 = vpop.eup %1636  ;;  %v789_v2 = vmul.f32 0.5, %v788_v60  ;;  %v2485_v49 = vadd.f32 0.001, %v679_v50  ;;  %v925_v43 = vsel %vm2496_vm12, %v2391_v35, %v921_v51  ;;  %v2525_v35 = vld [vmem:[%s2963_s2 + $0x30] sm:$0xff]  ;;  %vm802_vm3 = vweird.f32 %v2454_v39 }
 0x161   :  { %v665_v44 = vmax.f32 %v642_v41, 0.0  ;;  %1144 = vperm.xlu1 %1608, %v961_v63   ;;  %1033 = vrot.lane.b32.xlu2 %v983_v25, %s1689_s16  ;;  %v937_v54 = vmul.f32 %v2472_v0, %v2443_v36  ;;  %v984_v25 = vmul.f32 %v961_v63, %v2340_v61  ;;  %vm943_vm4 = vweird.f32 %v2472_v0  ;;  %v2585_v36 = vld [vmem:[%s2963_s2 + $0x38] sm:$0xff] }
 0x162   :  { %v790_v5 = vsub.f32 1.5, %v789_v2  ;;  %v385_v32 = vpop.f32.mrf.mxu2  ;;  %vm944_vm7 = vmor %vm942_vm5, %vm943_vm4  ;;  %vm952_vm12 = vweird.f32 %v2485_v49 }
 0x163   :  { %v2482_v59 = vpop.eup %1638  ;;  %v2487_v27 = vadd.f32 0.001, %v665_v44  ;;  %v2489_v33 = vmul.f32 0.0051020407, %v385_v32  ;;  %1061 = vrot.lane.b32.xlu0 %v997_v55, %s1689_s16  ;;  %v2505_v44 = vld [vmem:[%s2963_s2 + $0x98] sm:$0xff]  ;;  %v938_v1 = vmul.f32 %v2472_v0, %v937_v54  ;;  %v516_v55 = vpop.xlane.xlu2 %515 }
 0x164   :  { %v797_v62 = vmul.f32 %v2482_v59, %v2454_v39  ;;  %v791_v60 = vmul.f32 %v2451_v26, %v790_v5  ;;  %v975_v22 = vmul.f32 %v925_v43, %v2505_v44  ;;  %v931_v5 = vmul.f32 %v2441_v42, %v930_v6 }
 0x165   :  { %1640 = vrsqrt.f32 %v2487_v27  ;;  %v620_v57 = vmul.f32 %v2489_v33, %v2489_v33  ;;  %vm803_vm2 = vweird.f32 %v2482_v59  ;;  %vm812_vm9 = vweird.f32 %v2487_v27 }
 0x166   :  { %v798_v50 = vmul.f32 %v2482_v59, %v797_v62  ;;  %v795_v51 = vsel %vm2516_vm13, %v2451_v26, %v791_v60  ;;  %1642 = vrsqrt.f32 %v2485_v49  ;;  %v939_v26 = vmul.f32 0.5, %v938_v1  ;;  %v2549_v60 = vld [vmem:[%s2963_s2 + $0xa0] sm:$0xff]  ;;  %vm804_vm6 = vmor %vm802_vm3, %vm803_vm2 }
 0x167   :  { %v643_v41 = vsub.f32 %v597_v28, %v620_v57  ;;  %v962_v32 = vmul.f32 %v795_v51, %v2525_v35  ;;  %v598_v62 = vmul.f32 0.0051020407, %v516_v55  ;;  %v935_v58 = vsel %vm934_vm1, %v2441_v42, %v931_v5  ;;  %v520_v42 = vpop.xlane.xlu0 %519 }
 0x168   :  { %v799_v2 = vmul.f32 0.5, %v798_v50  ;;  %v940_v1 = vsub.f32 1.5, %v939_v26 }
 0x169   :  { %v666_v54 = vmax.f32 %v643_v41, 0.0  ;;  %1035 = vrot.lane.b32.xlu1 %v984_v25, %s1689_s16  ;;  %1214 = vperm.xlu2 %1610, %v975_v22   ;;  %v976_v41 = vmul.f32 %v935_v58, %v2549_v60  ;;  %v998_v25 = vmul.f32 %v975_v22, %v2312_v3  ;;  %v985_v26 = vmul.f32 %v962_v32, %v2370_v40 }
 0x16a   :  { %v388_v28 = vpop.f32.mrf.mxu2  ;;  %v800_v6 = vsub.f32 1.5, %v799_v2  ;;  %v941_v3 = vmul.f32 %v2472_v0, %v940_v1 }
 0x16b   :  { %v2538_v34 = vpop.eup %1640  ;;  %v2540_v63 = vadd.f32 0.001, %v666_v54  ;;  %v2542_v61 = vmul.f32 0.0051020407, %v388_v28  ;;  %1149 = vperm.xlu0 %1609, %v962_v32  }
 0x16c   :  { %v807_v43 = vmul.f32 %v2538_v34, %v2487_v27  ;;  %v2552_v57 = vpop.eup %1642  ;;  %v801_v5 = vmul.f32 %v2482_v59, %v800_v6  ;;  %vm813_vm8 = vweird.f32 %v2538_v34 }
 0x16d   :  { %1644 = vrsqrt.f32 %v2540_v63  ;;  %v621_v14 = vmul.f32 %v2542_v61, %v2542_v61  ;;  %v947_v2 = vmul.f32 %v2552_v57, %v2485_v49  ;;  %vm814_vm10 = vmor %vm812_vm9, %vm813_vm8  ;;  %vm953_vm11 = vweird.f32 %v2552_v57 }
 0x16e   :  { %v808_v50 = vmul.f32 %v2538_v34, %v807_v43  ;;  %v599_v43 = vmul.f32 0.0051020407, %v520_v42  ;;  %v805_v58 = vsel %vm804_vm6, %v2482_v59, %v801_v5  ;;  %vm954_vm14 = vmor %vm952_vm12, %vm953_vm11  ;;  %vm822_vm15 = vweird.f32 %v2540_v63 }
 0x16f   :  { %v644_v51 = vsub.f32 %v598_v62, %v621_v14  ;;  %v948_v40 = vmul.f32 %v2552_v57, %v947_v2  ;;  %v999_v2 = vmul.f32 %v976_v41, %v2335_v29  ;;  %v963_v59 = vmul.f32 %v805_v58, %v2585_v36  ;;  %v524_v42 = vpop.xlane.xlu1 %523 }
 0x170   :  { %v809_v55 = vmul.f32 0.5, %v808_v50  ;;  %v2594_v50 = vld [vmem:[%s2963_s2 + $0xa8] sm:$0xff] }
 0x171   :  { %v667_v54 = vmax.f32 %v644_v51, 0.0  ;;  %1219 = vperm.xlu1 %1608, %v976_v41   ;;  %1063 = vrot.lane.b32.xlu2 %v998_v25, %s1689_s16  ;;  %v945_v51 = vsel %vm944_vm7, %v2472_v0, %v941_v3  ;;  %v600_v41 = vmul.f32 0.0051020407, %v524_v42 }
 0x172   :  { %v391_v28 = vpop.f32.mrf.mxu2  ;;  %v810_v39 = vsub.f32 1.5, %v809_v55  ;;  %v949_v55 = vmul.f32 0.5, %v948_v40  ;;  %v2612_v40 = vld [vmem:[%s2963_s2 + $0x40] sm:$0xff] }
 0x173   :  { %v2569_v22 = vpop.eup %1644  ;;  %v2572_v62 = vadd.f32 0.001, %v667_v54  ;;  %v2574_v6 = vmul.f32 0.0051020407, %v391_v28  ;;  %1037 = vrot.lane.b32.xlu0 %v985_v26, %s1689_s16  ;;  %v977_v26 = vmul.f32 %v945_v51, %v2594_v50  ;;  %v986_v51 = vmul.f32 %v963_v59, %v2407_v52 }
 0x174   :  { %v817_v32 = vmul.f32 %v2569_v22, %v2540_v63  ;;  %v811_v5 = vmul.f32 %v2538_v34, %v810_v39  ;;  %vm823_vm13 = vweird.f32 %v2569_v22  ;;  %v2651_v63 = vld [vmem:[%s2963_s2 + $0x48] sm:$0xff] }
 0x175   :  { %v622_v14 = vmul.f32 %v2574_v6, %v2574_v6  ;;  %1646 = vrsqrt.f32 %v2572_v62  ;;  %v1000_v42 = vmul.f32 %v977_v26, %v2362_v20  ;;  %vm824_vm1 = vmor %vm822_vm15, %vm823_vm13  ;;  %vm832_vm6 = vweird.f32 %v2572_v62 }
 0x176   :  { %v818_v1 = vmul.f32 %v2569_v22, %v817_v32  ;;  %v815_v39 = vsel %vm814_vm10, %v2538_v34, %v811_v5 }
 0x177   :  { %v645_v25 = vsub.f32 %v599_v43, %v622_v14  ;;  %v950_v43 = vsub.f32 1.5, %v949_v55 }
 0x178   :  { %v819_v0 = vmul.f32 0.5, %v818_v1  ;;  %v964_v1 = vmul.f32 %v815_v39, %v2612_v40 }
 0x179   :  { %v668_v54 = vmax.f32 %v645_v25, 0.0  ;;  %1065 = vrot.lane.b32.xlu1 %v999_v2, %s1689_s16  ;;  %1154 = vperm.xlu2 %1610, %v963_v59   ;;  %v528_v2 = vpop.xlane.xlu2 %527  ;;  %v951_v55 = vmul.f32 %v2552_v57, %v950_v43 }
 0x17a   :  { %v394_v28 = vpop.f32.mrf.mxu2  ;;  %v820_v58 = vsub.f32 1.5, %v819_v0 }
 0x17b   :  { %v2605_v3 = vadd.f32 0.001, %v668_v54  ;;  %v2607_v29 = vmul.f32 0.0051020407, %v394_v28  ;;  %1224 = vperm.xlu0 %1609, %v977_v26   ;;  %v2615_v32 = vpop.eup %1646  ;;  %v601_v28 = vmul.f32 0.0051020407, %v528_v2 }
 0x17c   :  { %v827_v25 = vmul.f32 %v2615_v32, %v2572_v62  ;;  %v821_v54 = vmul.f32 %v2569_v22, %v820_v58  ;;  %v2642_v26 = vld [vmem:[%s2963_s2 + $0xb0] sm:$0xff]  ;;  %vm833_vm5 = vweird.f32 %v2615_v32 }
 0x17d   :  { %1648 = vrsqrt.f32 %v2605_v3  ;;  %v623_v27 = vmul.f32 %v2607_v29, %v2607_v29  ;;  %vm842_vm3 = vweird.f32 %v2605_v3  ;;  %vm834_vm8 = vmor %vm832_vm6, %vm833_vm5  ;;  %v2692_v62 = vld [vmem:[%s2963_s2 + $0x50] sm:$0xff] }
 0x17e   :  { %v828_v20 = vmul.f32 %v2615_v32, %v827_v25 }
 0x17f   :  { %v646_v14 = vsub.f32 %v600_v41, %v623_v27  ;;  %v955_v41 = vsel %vm954_vm14, %v2552_v57, %v951_v55  ;;  %v825_v27 = vsel %vm824_vm1, %v2569_v22, %v821_v54 }
 0x180   :  { %v829_v57 = vmul.f32 0.5, %v828_v20 }
 0x181   :  { %v669_v34 = vmax.f32 %v646_v14, 0.0  ;;  %1159 = vperm.xlu1 %1608, %v964_v1   ;;  %1039 = vrot.lane.b32.xlu2 %v986_v51, %s1689_s16  ;;  %v987_v14 = vmul.f32 %v964_v1, %v2456_v10  ;;  %v978_v51 = vmul.f32 %v955_v41, %v2642_v26  ;;  %v532_v2 = vpop.xlane.xlu0 %531 }
 0x182   :  { %v397_v5 = vpop.f32.mrf.mxu2  ;;  %v602_v10 = vmul.f32 0.0051020407, %v532_v2  ;;  %v830_v1 = vsub.f32 1.5, %v829_v57 }
 0x183   :  { %v1649_v52 = vpop.eup %1648  ;;  %v2631_v59 = vadd.f32 0.001, %v669_v34  ;;  %v2633_v0 = vmul.f32 0.0051020407, %v397_v5  ;;  %1067 = vrot.lane.b32.xlu0 %v1000_v42, %s1689_s16  ;;  %v965_v34 = vmul.f32 %v825_v27, %v2651_v63 }
 0x184   :  { %v837_v49 = vmul.f32 %v1649_v52, %v2605_v3  ;;  %vm843_vm2 = vweird.f32 %v1649_v52  ;;  %v1001_v3 = vmul.f32 %v978_v51, %v2387_v21 }
 0x185   :  { %1650 = vrsqrt.f32 %v2631_v59  ;;  %v624_v43 = vmul.f32 %v2633_v0, %v2633_v0  ;;  %vm844_vm4 = vmor %vm842_vm3, %vm843_vm2  ;;  %vm852_vm9 = vweird.f32 %v2631_v59 }
 0x186   :  { %v838_v39 = vmul.f32 %v1649_v52, %v837_v49 }
 0x187   :  { %v647_v58 = vsub.f32 %v601_v28, %v624_v43  ;;  %v2667_v28 = vld [vmem:[%s2963_s2 + $0x58] sm:$0xff] }
 0x188   :  { %v839_v25 = vmul.f32 0.5, %v838_v39 }
 0x189   :  { %v670_v55 = vmax.f32 %v647_v58, 0.0  ;;  %1041 = vrot.lane.b32.xlu1 %v987_v14, %s1689_s16  ;;  %1229 = vperm.xlu2 %1610, %v978_v51   ;;  %v536_v57 = vpop.xlane.xlu1 %535 }
 0x18a   :  { %v840_v42 = vsub.f32 1.5, %v839_v25  ;;  %v400_v5 = vpop.f32.mrf.mxu2  ;;  %v831_v25 = vmul.f32 %v2615_v32, %v830_v1 }
 0x18b   :  { %v1651_v49 = vpop.eup %1650  ;;  %v2658_v45 = vadd.f32 0.001, %v670_v55  ;;  %v2660_v22 = vmul.f32 0.0051020407, %v400_v5  ;;  %1164 = vperm.xlu0 %1609, %v965_v34   ;;  %v988_v55 = vmul.f32 %v965_v34, %v2489_v33 }
 0x18c   :  { %v847_v54 = vmul.f32 %v1651_v49, %v2631_v59  ;;  %v841_v20 = vmul.f32 %v1649_v52, %v840_v42  ;;  %vm853_vm7 = vweird.f32 %v1651_v49  ;;  %v835_v34 = vsel %vm834_vm8, %v2615_v32, %v831_v25  ;;  %v2702_v59 = vld [vmem:[%s2963_s2 + $0x60] sm:$0xff] }
 0x18d   :  { %1652 = vrsqrt.f32 %v2658_v45  ;;  %v625_v41 = vmul.f32 %v2660_v22, %v2660_v22  ;;  %vm854_vm10 = vmor %vm852_vm9, %vm853_vm7  ;;  %v966_v32 = vmul.f32 %v835_v34, %v2692_v62  ;;  %vm862_vm12 = vweird.f32 %v2658_v45 }
 0x18e   :  { %v848_v43 = vmul.f32 %v1651_v49, %v847_v54  ;;  %v845_v39 = vsel %vm844_vm4, %v1649_v52, %v841_v20 }
 0x18f   :  { %v648_v27 = vsub.f32 %v602_v10, %v625_v41  ;;  %v967_v58 = vmul.f32 %v845_v39, %v2667_v28  ;;  %v603_v10 = vmul.f32 0.0051020407, %v536_v57  ;;  %v989_v34 = vmul.f32 %v966_v32, %v2542_v61 }
 0x190   :  { %v849_v14 = vmul.f32 0.5, %v848_v43 }
 0x191   :  { %v671_v2 = vmax.f32 %v648_v27, 0.0  ;;  %1174 = vperm.xlu1 %1608, %v967_v58   ;;  %1069 = vrot.lane.b32.xlu2 %v1001_v3, %s1689_s16  ;;  %v990_v39 = vmul.f32 %v967_v58, %v2574_v6  ;;  %v540_v3 = vpop.xlane.xlu2 %539 }
 0x192   :  { %v850_v52 = vsub.f32 1.5, %v849_v14  ;;  %v403_v42 = vpop.f32.mrf.mxu2 }
 0x193   :  { %v2679_v5 = vpop.eup %1652  ;;  %v2681_v21 = vadd.f32 0.001, %v671_v2  ;;  %v2683_v51 = vmul.f32 0.0051020407, %v403_v42  ;;  %1043 = vrot.lane.b32.xlu0 %v988_v55, %s1689_s16  ;;  %v604_v42 = vmul.f32 0.0051020407, %v540_v3 }
 0x194   :  { %v857_v33 = vmul.f32 %v2679_v5, %v2658_v45  ;;  %v851_v1 = vmul.f32 %v1651_v49, %v850_v52  ;;  %vm863_vm11 = vweird.f32 %v2679_v5  ;;  %v2728_v45 = vld [vmem:[%s2963_s2 + $0x70] sm:$0xff] }
 0x195   :  { %1654 = vrsqrt.f32 %v2681_v21  ;;  %v626_v54 = vmul.f32 %v2683_v51, %v2683_v51  ;;  %vm864_vm14 = vmor %vm862_vm12, %vm863_vm11  ;;  %vm872_vm15 = vweird.f32 %v2681_v21 }
 0x196   :  { %v858_v20 = vmul.f32 %v2679_v5, %v857_v33  ;;  %v855_v41 = vsel %vm854_vm10, %v1651_v49, %v851_v1 }
 0x197   :  { %v649_v43 = vsub.f32 %v603_v10, %v626_v54  ;;  %v968_v57 = vmul.f32 %v855_v41, %v2702_v59 }
 0x198   :  { %v859_v27 = vmul.f32 0.5, %v858_v20 }
 0x199   :  { %v672_v14 = vmax.f32 %v649_v43, 0.0  ;;  %1047 = vrot.lane.b32.xlu1 %v990_v39, %s1689_s16  ;;  %1169 = vperm.xlu2 %1610, %v966_v32   ;;  %v544_v54 = vpop.xlane.xlu0 %543  ;;  %v991_v43 = vmul.f32 %v968_v57, %v2607_v29 }
 0x19a   :  { %v406_v25 = vpop.f32.mrf.mxu2  ;;  %v860_v49 = vsub.f32 1.5, %v859_v27  ;;  %v605_v32 = vmul.f32 0.0051020407, %v544_v54 }
 0x19b   :  { %v1655_v2 = vpop.eup %1654  ;;  %v718_v55 = vadd.f32 0.001, %v672_v14  ;;  %v2708_v52 = vmul.f32 0.0051020407, %v406_v25  ;;  %1179 = vperm.xlu0 %1609, %v968_v57   ;;  %v2733_v57 = vld [vmem:[%s2963_s2 + $0x68] sm:$0xff] }
 0x19c   :  { %v867_v6 = vmul.f32 %v1655_v2, %v2681_v21  ;;  %v861_v20 = vmul.f32 %v2679_v5, %v860_v49  ;;  %vm873_vm13 = vweird.f32 %v1655_v2 }
 0x19d   :  { %1656 = vrsqrt.f32 %v718_v55  ;;  %v627_v58 = vmul.f32 %v2708_v52, %v2708_v52  ;;  %vm874_vm1 = vmor %vm872_vm15, %vm873_vm13  ;;  %vm882_vm3 = vweird.f32 %v718_v55 }
 0x19e   :  { %v868_v10 = vmul.f32 %v1655_v2, %v867_v6  ;;  %v865_v49 = vsel %vm864_vm14, %v2679_v5, %v861_v20 }
 0x19f   :  { %v650_v33 = vsub.f32 %v604_v42, %v627_v58 }
 0x1a0   :  { %v869_v1 = vmul.f32 0.5, %v868_v10 }
 0x1a1   :  { %v673_v41 = vmax.f32 %v650_v33, 0.0  ;;  %1045 = vrot.lane.b32.xlu2 %v989_v34, %s1689_s16  ;;  %v969_v34 = vmul.f32 %v865_v49, %v2733_v57 }
 0x1a2   :  { %v870_v39 = vsub.f32 1.5, %v869_v1  ;;  %v409_v27 = vpop.f32.mrf.mxu2 }
 0x1a3   :  { %v1657_v3 = vpop.eup %1656  ;;  %v719_v14 = vadd.f32 0.001, %v673_v41  ;;  %v2719_v25 = vmul.f32 0.0051020407, %v409_v27  ;;  %v2721_v61 = vpop.permute.xlu2 %1129  ;;  %1049 = vrot.lane.b32.xlu0 %v991_v43, %s1689_s16 }
 0x1a4   :  { %v877_v42 = vmul.f32 %v1657_v3, %v718_v55  ;;  %v871_v29 = vmul.f32 %v1655_v2, %v870_v39  ;;  %vm883_vm2 = vweird.f32 %v1657_v3 }
 0x1a5   :  { %1658 = vrsqrt.f32 %v719_v14  ;;  %v628_v6 = vmul.f32 %v2719_v25, %v2719_v25  ;;  %vm884_vm4 = vmor %vm882_vm3, %vm883_vm2  ;;  %vm892_vm6 = vweird.f32 %v719_v14 }
 0x1a6   :  { %v878_v21 = vmul.f32 %v1657_v3, %v877_v42  ;;  %v875_v58 = vsel %vm874_vm1, %v1655_v2, %v871_v29  ;;  %v2744_v2 = vld [vmem:[%s2963_s2 + $0x78] sm:$0xff]  ;;  %v992_v29 = vmul.f32 %v969_v34, %v2633_v0 }
 0x1a7   :  { %v651_v10 = vsub.f32 %v605_v32, %v628_v6  ;;  %v970_v33 = vmul.f32 %v875_v58, %v2728_v45  ;;  %v1690_v58 = vmov 1  }
 0x1a8   :  { %v879_v1 = vmul.f32 0.5, %v878_v21 }
 0x1a9   :  { %v674_v54 = vmax.f32 %v651_v10, 0.0  ;;  %1189 = vperm.xlu1 %1608, %v970_v33   ;;  %1184 = vperm.xlu2 %1610, %v969_v34   ;;  %v993_v42 = vmul.f32 %v970_v33, %v2660_v22 }
 0x1aa   :  { %v880_v41 = vsub.f32 1.5, %v879_v1 }
 0x1ab   :  { %v1659_v43 = vpop.eup %1658  ;;  %v720_v5 = vadd.f32 0.001, %v674_v54  ;;  %v1030_v20 = vpop.permute.xlu2 %1029 }
 0x1ac   :  { %v887_v39 = vmul.f32 %v1659_v43, %v719_v14  ;;  %v881_v27 = vmul.f32 %v1657_v3, %v880_v41  ;;  %vm893_vm5 = vweird.f32 %v1659_v43  ;;  %v2753_v0 = vpop.permute.xlu1 %1119 }
 0x1ad   :  { %1660 = vrsqrt.f32 %v720_v5  ;;  %v1026_v1 = vpop.permute.xlu0 %1025  ;;  %vm894_vm7 = vmor %vm892_vm6, %vm893_vm5  ;;  %vm902_vm9 = vweird.f32 %v720_v5 }
 0x1ae   :  { %v888_v32 = vmul.f32 %v1659_v43, %v887_v39  ;;  %v885_v49 = vsel %vm884_vm4, %v1657_v3, %v881_v27  ;;  %v2758_v3 = vld [vmem:[%s2963_s2 + $0x80] sm:$0xff]  ;;  %v1094_v41 = vsub.f32 %v2303_v9, %v1026_v1 }
 0x1af   :  { %v971_v21 = vmul.f32 %v885_v49, %v2744_v2  ;;  %v2767_v49 = vld [vmem:[%s2963_s2 + $0x88] sm:$0xff]  ;;  %s1691_s2 = smov [#allocation2]  }
 0x1b0   :  { %v889_v6 = vmul.f32 0.5, %v888_v32 }
 0x1b1   :  { %1053 = vrot.lane.b32.xlu1 %v993_v42, %s1689_s16  ;;  %1051 = vrot.lane.b32.xlu2 %v992_v29, %s1689_s16  ;;  %v994_v42 = vmul.f32 %v971_v21, %v2683_v51 }
 0x1b2   :  { %v890_v55 = vsub.f32 1.5, %v889_v6  ;;  %1194 = vperm.xlu0 %1609, %v971_v21   ;;  %1611 = vset.pattern.permute.xlu1 %v1690_v58 }
 0x1b3   :  { %v1661_v10 = vpop.eup %1660  ;;  %v2751_v54 = vpop.permute.xlu2 %1139 }
 0x1b4   :  { %v897_v22 = vmul.f32 %v1661_v10, %v720_v5  ;;  %v891_v33 = vmul.f32 %v1659_v43, %v890_v55  ;;  %vm903_vm8 = vweird.f32 %v1661_v10 }
 0x1b5   :  { %v2769_v6 = vpop.permute.xlu0 %1124  ;;  %vm904_vm10 = vmor %vm902_vm9, %vm903_vm8 }
 0x1b6   :  { %v898_v34 = vmul.f32 %v1661_v10, %v897_v22  ;;  %v895_v39 = vsel %vm894_vm7, %v1659_v43, %v891_v33  ;;  %v1028_v43 = vpop.permute.xlu1 %1027  ;;  %v3032_v22 = vmov 0  }
 0x1b7   :  { %v972_v32 = vmul.f32 %v895_v39, %v2758_v3  ;;  %v1095_v55 = vsub.f32 %v2323_v12, %v1028_v43 }
 0x1b8   :  { %v899_v27 = vmul.f32 0.5, %v898_v34  ;;  %v1096_v34 = vsub.f32 %v2348_v46, %v1030_v20 }
 0x1b9   :  { %1280 = vperm.xlu1 %1611, %v1094_v41   ;;  %1199 = vperm.xlu2 %1610, %v972_v32   ;;  %v995_v1 = vmul.f32 %v972_v32, %v2708_v52 }
 0x1ba   :  { %v900_v29 = vsub.f32 1.5, %v899_v27  ;;  %1055 = vrot.lane.b32.xlu0 %v994_v42, %s1689_s16 }
 0x1bb   :  { %v1034_v14 = vpop.permute.xlu2 %1033  ;;  %1612 = vset.pattern.permute.xlu0 %v1690_v58 }
 0x1bc   :  { %v901_v9 = vmul.f32 %v1661_v10, %v900_v29  ;;  %v1098_v39 = vsub.f32 %v2415_v13, %v1034_v14 }
 0x1be   :  { %v905_v51 = vsel %vm904_vm10, %v1661_v10, %v901_v9 }
 0x1bf   :  { %v973_v21 = vmul.f32 %v905_v51, %v2767_v49 }
 0x1c1   :  { %1614 = vset.pattern.permute.xlu1 %v3032_v22  ;;  %1057 = vrot.lane.b32.xlu2 %v995_v1, %s1689_s16  ;;  %v996_v10 = vmul.f32 %v973_v21, %v2719_v25 }
 0x1c2   :  { %1285 = vperm.xlu0 %1612, %v1095_v55   ;;  %1204 = vperm.xlu1 %1614, %v973_v21  }
 0x1c3   :  { %v2776_v5 = vpop.permute.xlu2 %1214  ;;  %1613 = vset.pattern.permute.xlu2 %v1690_v58  ;;  %v2780_v41 = vpop.permute.xlu1 %1134 }
 0x1c5   :  { %v1032_v33 = vpop.permute.xlu0 %1031 }
 0x1c6   :  { %v1097_v27 = vsub.f32 %v2378_v56, %v1032_v33 }
 0x1c9   :  { %1290 = vperm.xlu2 %1613, %v1096_v34  }
 0x1ca   :  { %1059 = vrot.lane.b32.xlu1 %v996_v10, %s1689_s16  ;;  %s1489_s16 = sshll.u32 %s1691_s2, 4  ;;  %s1490_s16 = int_to_ptr.vmem [resolvable:$true] %s1489_s16 }
 0x1cb   :  { %v1064_v12 = vpop.permute.xlu2 %1063  ;;  %1615 = vset.pattern.permute.xlu1 %v1690_v58 }
 0x1cc   :  { %v1113_v42 = vsub.f32 %v2505_v44, %v1064_v12 }
 0x1cd   :  { %v2783_v52 = vpop.permute.xlu0 %1209 }
 0x1d1   :  { %1300 = vperm.xlu2 %1613, %v1098_v39  }
 0x1d2   :  { %1295 = vperm.xlu1 %1615, %v1097_v27  }
 0x1d3   :  { %v2787_v32 = vpop.permute.xlu1 %1144  ;;  %v2789_v46 = vpop.permute.xlu2 %1154 }
 0x1d5   :  { %v1062_v25 = vpop.permute.xlu0 %1061 }
 0x1d6   :  { %v1112_v20 = vsub.f32 %v2435_v47, %v1062_v25 }
 0x1d8   :  { %1370 = vperm.xlu0 %1612, %v1112_v20  }
 0x1d9   :  { %1375 = vperm.xlu2 %1613, %v1113_v42  }
 0x1db   :  { %v1036_v58 = vpop.permute.xlu1 %1035  ;;  %v1040_v29 = vpop.permute.xlu2 %1039 }
 0x1dc   :  { %v1099_v9 = vsub.f32 %v2464_v53, %v1036_v58  ;;  %v1101_v56 = vsub.f32 %v2585_v36, %v1040_v29 }
 0x1dd   :  { %v2794_v13 = vpop.permute.xlu0 %1149 }
 0x1de   :  { %1305 = vperm.xlu1 %1615, %v1099_v9  }
 0x1e1   :  { %1315 = vperm.xlu2 %1613, %v1101_v56  }
 0x1e3   :  { %v2797_v14 = vpop.permute.xlu1 %1219  ;;  %v2799_v43 = vpop.permute.xlu2 %1229 }
 0x1e5   :  { %v1038_v51 = vpop.permute.xlu0 %1037 }
 0x1e6   :  { %v1100_v47 = vsub.f32 %v2525_v35, %v1038_v51 }
 0x1e8   :  { %1310 = vperm.xlu0 %1612, %v1100_v47  }
 0x1eb   :  { %v2802_v44 = vpop.permute.xlu1 %1065  ;;  %v1070_v21 = vpop.permute.xlu2 %1069 }
 0x1ed   :  { %v2804_v55 = vpop.permute.xlu0 %1224 }
 0x1f3   :  { %v2806_v53 = vpop.permute.xlu1 %1159  ;;  %v2808_v1 = vpop.permute.xlu2 %1169 }
 0x1f5   :  { %v2810_v22 = vpop.permute.xlu0 %1067 }
 0x1fb   :  { %v1042_v36 = vpop.permute.xlu1 %1041  ;;  %v1046_v33 = vpop.permute.xlu2 %1045 }
 0x1fc   :  { %v1102_v34 = vsub.f32 %v2612_v40, %v1042_v36  ;;  %v1104_v10 = vsub.f32 %v2692_v62, %v1046_v33 }
 0x1fd   :  { %v2814_v12 = vpop.permute.xlu0 %1164 }
 0x1fe   :  { %1330 = vperm.xlu2 %1613, %v1104_v10   ;;  %1320 = vperm.xlu1 %1615, %v1102_v34  }
 0x203   :  { %v2816_v35 = vpop.permute.xlu1 %1174  ;;  %v2818_v39 = vpop.permute.xlu2 %1184 }
 0x205   :  { %v1044_v27 = vpop.permute.xlu0 %1043 }
 0x206   :  { %v1103_v25 = vsub.f32 %v2651_v63, %v1044_v27 }
 0x208   :  { %1325 = vperm.xlu0 %1612, %v1103_v25  }
 0x20b   :  { %v1048_v20 = vpop.permute.xlu1 %1047  ;;  %v1052_v42 = vpop.permute.xlu2 %1051 }
 0x20c   :  { %v1105_v58 = vsub.f32 %v2667_v28, %v1048_v20  ;;  %v1107_v40 = vsub.f32 %v2733_v57, %v1052_v42  ;;  %v1236_v28 = vmul.f32 %v2721_v61, %v2058_v24  ;;  %v1237_v57 = vmul.f32 %v2721_v61, %v2056_v23 }
 0x20d   :  { %v2823_v29 = vpop.permute.xlu0 %1179  ;;  %v1232_v24 = vmul.f32 %v2753_v0, %v2010_v8  ;;  %v1233_v23 = vmul.f32 %v2753_v0, %v2008_v7  ;;  %v1240_v61 = vmul.f32 %v2751_v54, %v2088_v38  ;;  %v1234_v7 = vmul.f32 %v2769_v6, %v2034_v16 }
 0x20e   :  { %1345 = vperm.xlu2 %1613, %v1107_v40   ;;  %1335 = vperm.xlu1 %1615, %v1105_v58   ;;  %v1270_v8 = vmul.f32 %v2776_v5, %v2044_v19  ;;  %v1235_v38 = vmul.f32 %v2769_v6, %v2032_v15  ;;  %v1115_v0 = vsub.f32 %v2594_v50, %v2810_v22 }
 0x20f   :  { %v1246_v15 = vmul.f32 %v2789_v46, %v2139_v18  ;;  %v1247_v19 = vmul.f32 %v2789_v46, %v2137_v17  ;;  %v1114_v17 = vsub.f32 %v2549_v60, %v2802_v44 }
 0x213   :  { %v2825_v62 = vpop.permute.xlu2 %1199 }
 0x215   :  { %v1050_v9 = vpop.permute.xlu0 %1049 }
 0x216   :  { %v1106_v56 = vsub.f32 %v2702_v59, %v1050_v9  ;;  %v1116_v59 = vsub.f32 %v2642_v26, %v1070_v21 }
 0x218   :  { %1340 = vperm.xlu0 %1612, %v1106_v56  }
 0x21b   :  { %v2828_v51 = vpop.permute.xlu1 %1189  ;;  %v1058_v63 = vpop.permute.xlu2 %1057 }
 0x21c   :  { %v1110_v47 = vsub.f32 %v2758_v3, %v1058_v63 }
 0x21e   :  { %1360 = vperm.xlu2 %1613, %v1110_v47  }
 0x223   :  { %v1054_v36 = vpop.permute.xlu1 %1053  ;;  %v1291_v34 = vpop.permute.xlu2 %1290 }
 0x224   :  { %v1108_v33 = vsub.f32 %v2728_v45, %v1054_v36  ;;  %v2836_v10 = vpop.permute.xlu0 %1194  ;;  %v1397_v27 = vadd.f32 %v1291_v34, %v1236_v28  ;;  %v1398_v25 = vadd.f32 %v1291_v34, %v1237_v57  ;;  %v1241_v45 = vmul.f32 %v2751_v54, %v2086_v37 }
 0x225   :  { %v1271_v37 = vmul.f32 %v2776_v5, %v2129_v4  ;;  %v1238_v57 = vmul.f32 %v2780_v41, %v2073_v31  ;;  %v1239_v36 = vmul.f32 %v2780_v41, %v2071_v30  ;;  %v1269_v34 = vmul.f32 %v2783_v52, %v2111_v48  ;;  %v3033_v30 = vld [vmem:[#allocation9_spill] sm:$0xff]  ;;  %v3034_v41 = vld [vmem:[#allocation8_spill] sm:$0xff] }
 0x226   :  { %1350 = vperm.xlu1 %1615, %v1108_v33   ;;  %1443 = vst [vmem:[#allocation2 + $0x20] sm:$0xff] %v1397_v27  ;;  %1390 = vperm.xlu2 %1613, %v1116_v59   ;;  %v1242_v60 = vmul.f32 %v2787_v32, %v3033_v30  ;;  %v1243_v44 = vmul.f32 %v2787_v32, %v3034_v41  ;;  %v3035_v48 = vld [vmem:[#allocation20_spill] sm:$0xff] }
 0x227   :  { %1444 = vst.msk [vmem:[#allocation2 + $0x28] sm:$0xff] %vm300_vm0, %v1398_v25 }
 0x22b   :  { %v1281_v26 = vpop.permute.xlu1 %1280  ;;  %v1301_v3 = vpop.permute.xlu2 %1300 }
 0x22c   :  { %v1393_v21 = vadd.f32 %v1281_v26, %v1232_v24  ;;  %v1056_v20 = vpop.permute.xlu0 %1055  ;;  %v1401_v42 = vadd.f32 %v1301_v3, %v1240_v61  ;;  %v1402_v58 = vadd.f32 %v1301_v3, %v1241_v45  ;;  %v1394_v40 = vadd.f32 %v1281_v26, %v1233_v23  ;;  %v3036_v23 = vld [vmem:[#allocation19_spill] sm:$0xff] }
 0x22d   :  { %v1109_v9 = vsub.f32 %v2744_v2, %v1056_v20  ;;  %v1253_v61 = vmul.f32 %v2808_v1, %v3036_v23  ;;  %v3037_v26 = vld [vmem:[#allocation11_spill] sm:$0xff] }
 0x22e   :  { %1439 = vst [vmem:[#allocation2] sm:$0xff] %v1393_v21  ;;  %v1244_v3 = vmul.f32 %v2794_v13, %v3037_v26  ;;  %v3038_v21 = vld [vmem:[#allocation10_spill] sm:$0xff]  ;;  %v3052_v23 = vld [vmem:[#allocation23_spill] sm:$0xff]  ;;  %v3053_v26 = vld [vmem:[#allocation28_spill] sm:$0xff] }
 0x22f   :  { %1447 = vst [vmem:[#allocation2 + $0x40] sm:$0xff] %v1401_v42  ;;  %1355 = vperm.xlu0 %1612, %v1109_v9   ;;  %v1245_v20 = vmul.f32 %v2794_v13, %v3038_v21  ;;  %v3054_v21 = vld [vmem:[#allocation27_spill] sm:$0xff] }
 0x230   :  { %1448 = vst.msk [vmem:[#allocation2 + $0x48] sm:$0xff] %vm300_vm0, %v1402_v58 }
 0x231   :  { %1440 = vst.msk [vmem:[#allocation2 + $0x8] sm:$0xff] %vm300_vm0, %v1394_v40 }
 0x233   :  { %v1376_v2 = vpop.permute.xlu2 %1375 }
 0x234   :  { %v1286_v54 = vpop.permute.xlu0 %1285  ;;  %v1431_v56 = vadd.f32 %v1376_v2, %v1270_v8  ;;  %v1432_v63 = vadd.f32 %v1376_v2, %v1271_v37  ;;  %v2861_v28 = vpop.permute.xlu1 %1204  ;;  %v3040_v8 = vld [vmem:[#allocation25_spill] sm:$0xff] }
 0x235   :  { %v1395_v47 = vadd.f32 %v1286_v54, %v1234_v7  ;;  %v1396_v16 = vadd.f32 %v1286_v54, %v1235_v38  ;;  %v3039_v7 = vld [vmem:[#allocation26_spill] sm:$0xff]  ;;  %v1259_v37 = vmul.f32 %v2818_v39, %v3040_v8 }
 0x236   :  { %1477 = vst [vmem:[#allocation2 + $0x130] sm:$0xff] %v1431_v56  ;;  %v3041_v54 = vld [vmem:[#allocation14_spill] sm:$0xff]  ;;  %v3042_v56 = vld [vmem:[#allocation13_spill] sm:$0xff] }
 0x237   :  { %1385 = vperm.xlu0 %1612, %v1115_v0   ;;  %1478 = vst.msk [vmem:[#allocation2 + $0x138] sm:$0xff] %vm300_vm0, %v1432_v63  ;;  %v1248_v0 = vmul.f32 %v2806_v53, %v3041_v54  ;;  %v1249_v63 = vmul.f32 %v2806_v53, %v3042_v56 }
 0x238   :  { %1441 = vst [vmem:[#allocation2 + $0x10] sm:$0xff] %v1395_v47 }
 0x239   :  { %1442 = vst.msk [vmem:[#allocation2 + $0x18] sm:$0xff] %vm300_vm0, %v1396_v16 }
 0x23b   :  { %v1316_v4 = vpop.permute.xlu2 %1315 }
 0x23c   :  { %v1407_v50 = vadd.f32 %v1316_v4, %v1246_v15  ;;  %v1408_v6 = vadd.f32 %v1316_v4, %v1247_v19  ;;  %v1060_v5 = vpop.permute.xlu1 %1059  ;;  %v3043_v19 = vld [vmem:[#allocation32_spill] sm:$0xff]  ;;  %v3044_v4 = vld [vmem:[#allocation31_spill] sm:$0xff] }
 0x23d   :  { %v1111_v22 = vsub.f32 %v2767_v49, %v1060_v5  ;;  %v1268_v49 = vmul.f32 %v2783_v52, %v2020_v11  ;;  %v1252_v52 = vmul.f32 %v2808_v1, %v3035_v48  ;;  %v1258_v1 = vmul.f32 %v2818_v39, %v3039_v7  ;;  %v3051_v48 = vld [vmem:[#allocation24_spill] sm:$0xff] }
 0x23e   :  { %1453 = vst [vmem:[#allocation2 + $0x70] sm:$0xff] %v1407_v50  ;;  %v1264_v39 = vmul.f32 %v2825_v62, %v3043_v19  ;;  %v1265_v50 = vmul.f32 %v2825_v62, %v3044_v4  ;;  %v3048_v62 = vld [vmem:[#allocation7_spill] sm:$0xff] }
 0x23f   :  { %1454 = vst.msk [vmem:[#allocation2 + $0x78] sm:$0xff] %vm300_vm0, %v1408_v6  ;;  %1365 = vperm.xlu1 %1615, %v1111_v22   ;;  %v3045_v6 = vld [vmem:[#allocation17_spill] sm:$0xff]  ;;  %v3046_v22 = vld [vmem:[#allocation16_spill] sm:$0xff] }
 0x240   :  { %v1250_v5 = vmul.f32 %v2814_v12, %v3045_v6 }
 0x244   :  { %v1296_v18 = vpop.permute.xlu1 %1295 }
 0x245   :  { %v1399_v46 = vadd.f32 %v1296_v18, %v1238_v57  ;;  %v1400_v33 = vadd.f32 %v1296_v18, %v1239_v36  ;;  %v1251_v57 = vmul.f32 %v2814_v12, %v3046_v22 }
 0x247   :  { %1445 = vst [vmem:[#allocation2 + $0x30] sm:$0xff] %v1399_v46  ;;  %1380 = vperm.xlu1 %1615, %v1114_v17  }
 0x248   :  { %1446 = vst.msk [vmem:[#allocation2 + $0x38] sm:$0xff] %vm300_vm0, %v1400_v33 }
 0x24a   :  { %v1371_v31 = vpop.permute.xlu0 %1370 }
 0x24b   :  { %v1429_v59 = vadd.f32 %v1371_v31, %v1268_v49  ;;  %v1430_v27 = vadd.f32 %v1371_v31, %v1269_v34  ;;  %v3047_v49 = vld [vmem:[#allocation22_spill] sm:$0xff]  ;;  %v1276_v31 = vmul.f32 %v2799_v43, %v3048_v62 }
 0x24c   :  { %v1254_v34 = vmul.f32 %v2816_v35, %v3047_v49 }
 0x24d   :  { %1475 = vst [vmem:[#allocation2 + $0x120] sm:$0xff] %v1429_v59  ;;  %v3049_v59 = vld [vmem:[#allocation18_spill] sm:$0xff] }
 0x24e   :  { %1476 = vst.msk [vmem:[#allocation2 + $0x128] sm:$0xff] %vm300_vm0, %v1430_v27  ;;  %v1277_v12 = vmul.f32 %v2799_v43, %v3049_v59  ;;  %v3050_v27 = vld [vmem:[#allocation21_spill] sm:$0xff]  ;;  %v1257_v43 = vmul.f32 %v2823_v29, %v3052_v23 }
 0x24f   :  { %v1255_v30 = vmul.f32 %v2816_v35, %v3050_v27 }
 0x250   :  { %v1306_v25 = vpop.permute.xlu1 %1305 }
 0x251   :  { %v1403_v24 = vadd.f32 %v1306_v25, %v1242_v60  ;;  %v1404_v11 = vadd.f32 %v1306_v25, %v1243_v44 }
 0x253   :  { %1449 = vst [vmem:[#allocation2 + $0x50] sm:$0xff] %v1403_v24 }
 0x254   :  { %1450 = vst.msk [vmem:[#allocation2 + $0x58] sm:$0xff] %vm300_vm0, %v1404_v11 }
 0x258   :  { %v1331_v45 = vpop.permute.xlu2 %1330 }
 0x259   :  { %v1413_v32 = vadd.f32 %v1331_v45, %v1252_v52  ;;  %v1414_v42 = vadd.f32 %v1331_v45, %v1253_v61  ;;  %v1256_v52 = vmul.f32 %v2823_v29, %v3051_v48 }
 0x25a   :  { %v1311_v58 = vpop.permute.xlu0 %1310 }
 0x25b   :  { %1459 = vst [vmem:[#allocation2 + $0xa0] sm:$0xff] %v1413_v32  ;;  %v1405_v40 = vadd.f32 %v1311_v58, %v1244_v3  ;;  %v1406_v9 = vadd.f32 %v1311_v58, %v1245_v20  ;;  %v1260_v3 = vmul.f32 %v2828_v51, %v3053_v26  ;;  %v1261_v20 = vmul.f32 %v2828_v51, %v3054_v21 }
 0x25c   :  { %1460 = vst.msk [vmem:[#allocation2 + $0xa8] sm:$0xff] %vm300_vm0, %v1414_v42 }
 0x25d   :  { %1451 = vst [vmem:[#allocation2 + $0x60] sm:$0xff] %v1405_v40  ;;  %v3055_v40 = vld [vmem:[#allocation30_spill] sm:$0xff] }
 0x25e   :  { %1452 = vst.msk [vmem:[#allocation2 + $0x68] sm:$0xff] %vm300_vm0, %v1406_v9  ;;  %v1262_v29 = vmul.f32 %v2836_v10, %v3055_v40  ;;  %v3056_v9 = vld [vmem:[#allocation29_spill] sm:$0xff] }
 0x25f   :  { %v1263_v7 = vmul.f32 %v2836_v10, %v3056_v9 }
 0x268   :  { %v1346_v38 = vpop.permute.xlu2 %1345 }
 0x269   :  { %v1419_v2 = vadd.f32 %v1346_v38, %v1258_v1  ;;  %v1420_v13 = vadd.f32 %v1346_v38, %v1259_v37  ;;  %v3057_v38 = vld [vmem:[#allocation6_spill] sm:$0xff] }
 0x26a   :  { %v1274_v51 = vmul.f32 %v2804_v55, %v3057_v38 }
 0x26b   :  { %1465 = vst [vmem:[#allocation2 + $0xd0] sm:$0xff] %v1419_v2  ;;  %v3058_v2 = vld [vmem:[#allocation15_spill] sm:$0xff] }
 0x26c   :  { %1466 = vst.msk [vmem:[#allocation2 + $0xd8] sm:$0xff] %vm300_vm0, %v1420_v13  ;;  %v1275_v13 = vmul.f32 %v2804_v55, %v3058_v2  ;;  %v3061_v55 = vld [vmem:[#allocation5_spill] sm:$0xff] }
 0x26d   :  { %v1272_v4 = vmul.f32 %v2797_v14, %v3061_v55 }
 0x270   :  { %v1321_v47 = vpop.permute.xlu1 %1320 }
 0x271   :  { %v1409_v16 = vadd.f32 %v1321_v47, %v1248_v0  ;;  %v1410_v15 = vadd.f32 %v1321_v47, %v1249_v63  ;;  %v3059_v63 = vld [vmem:[#allocation34_spill] sm:$0xff]  ;;  %v3060_v47 = vld [vmem:[#allocation33_spill] sm:$0xff] }
 0x272   :  { %v1266_v10 = vmul.f32 %v2861_v28, %v3059_v63 }
 0x273   :  { %1455 = vst [vmem:[#allocation2 + $0x80] sm:$0xff] %v1409_v16  ;;  %v1267_v16 = vmul.f32 %v2861_v28, %v3060_v47 }
 0x274   :  { %1456 = vst.msk [vmem:[#allocation2 + $0x88] sm:$0xff] %vm300_vm0, %v1410_v15 }
 0x278   :  { %v1361_v36 = vpop.permute.xlu2 %1360 }
 0x279   :  { %v1425_v53 = vadd.f32 %v1361_v36, %v1264_v39  ;;  %v1426_v18 = vadd.f32 %v1361_v36, %v1265_v50  ;;  %v3062_v50 = vld [vmem:[#allocation12_spill] sm:$0xff] }
 0x27a   :  { %v1326_v17 = vpop.permute.xlu0 %1325  ;;  %v1273_v6 = vmul.f32 %v2797_v14, %v3062_v50 }
 0x27b   :  { %v1411_v46 = vadd.f32 %v1326_v17, %v1250_v5  ;;  %v1412_v33 = vadd.f32 %v1326_v17, %v1251_v57  ;;  %1471 = vst [vmem:[#allocation2 + $0x100] sm:$0xff] %v1425_v53 }
 0x27c   :  { %1472 = vst.msk [vmem:[#allocation2 + $0x108] sm:$0xff] %vm300_vm0, %v1426_v18 }
 0x27d   :  { %1457 = vst [vmem:[#allocation2 + $0x90] sm:$0xff] %v1411_v46 }
 0x27e   :  { %1458 = vst.msk [vmem:[#allocation2 + $0x98] sm:$0xff] %vm300_vm0, %v1412_v33 }
 0x280   :  { %v1336_v60 = vpop.permute.xlu1 %1335  ;;  %v1391_v41 = vpop.permute.xlu2 %1390 }
 0x281   :  { %v1415_v44 = vadd.f32 %v1336_v60, %v1254_v34  ;;  %v1437_v25 = vadd.f32 %v1391_v41, %v1276_v31  ;;  %v1438_v24 = vadd.f32 %v1391_v41, %v1277_v12  ;;  %v1416_v11 = vadd.f32 %v1336_v60, %v1255_v30 }
 0x283   :  { %1461 = vst [vmem:[#allocation2 + $0xb0] sm:$0xff] %v1415_v44 }
 0x284   :  { %1483 = vst [vmem:[#allocation2 + $0x160] sm:$0xff] %v1437_v25 }
 0x285   :  { %1484 = vst.msk [vmem:[#allocation2 + $0x168] sm:$0xff] %vm300_vm0, %v1438_v24 }
 0x286   :  { %1462 = vst.msk [vmem:[#allocation2 + $0xb8] sm:$0xff] %vm300_vm0, %v1416_v11 }
 0x28a   :  { %v1341_v61 = vpop.permute.xlu0 %1340 }
 0x28b   :  { %v1417_v35 = vadd.f32 %v1341_v61, %v1256_v52  ;;  %v1418_v45 = vadd.f32 %v1341_v61, %v1257_v43 }
 0x28d   :  { %1463 = vst [vmem:[#allocation2 + $0xc0] sm:$0xff] %v1417_v35 }
 0x28e   :  { %1464 = vst.msk [vmem:[#allocation2 + $0xc8] sm:$0xff] %vm300_vm0, %v1418_v45 }
 0x298   :  { %v1351_v32 = vpop.permute.xlu1 %1350 }
 0x299   :  { %v1421_v42 = vadd.f32 %v1351_v32, %v1260_v3  ;;  %v1422_v58 = vadd.f32 %v1351_v32, %v1261_v20 }
 0x29b   :  { %1467 = vst [vmem:[#allocation2 + $0xe0] sm:$0xff] %v1421_v42 }
 0x29c   :  { %1468 = vst.msk [vmem:[#allocation2 + $0xe8] sm:$0xff] %vm300_vm0, %v1422_v58 }
 0x2a1   :  { %v1356_v1 = vpop.permute.xlu0 %1355 }
 0x2a2   :  { %v1423_v8 = vadd.f32 %v1356_v1, %v1262_v29  ;;  %v1424_v37 = vadd.f32 %v1356_v1, %v1263_v7 }
 0x2a4   :  { %1469 = vst [vmem:[#allocation2 + $0xf0] sm:$0xff] %v1423_v8 }
 0x2a5   :  { %1470 = vst.msk [vmem:[#allocation2 + $0xf8] sm:$0xff] %vm300_vm0, %v1424_v37 }
 0x2a9   :  { %v1386_v54 = vpop.permute.xlu0 %1385 }
 0x2aa   :  { %v1435_v0 = vadd.f32 %v1386_v54, %v1274_v51  ;;  %v1436_v56 = vadd.f32 %v1386_v54, %v1275_v13 }
 0x2ac   :  { %1481 = vst [vmem:[#allocation2 + $0x150] sm:$0xff] %v1435_v0 }
 0x2ad   :  { %1482 = vst.msk [vmem:[#allocation2 + $0x158] sm:$0xff] %vm300_vm0, %v1436_v56 }
 0x2b1   :  { %v1366_v15 = vpop.permute.xlu1 %1365 }
 0x2b2   :  { %v1427_v19 = vadd.f32 %v1366_v15, %v1266_v10  ;;  %v1428_v39 = vadd.f32 %v1366_v15, %v1267_v16 }
 0x2b4   :  { %1473 = vst [vmem:[#allocation2 + $0x110] sm:$0xff] %v1427_v19 }
 0x2b5   :  { %1474 = vst.msk [vmem:[#allocation2 + $0x118] sm:$0xff] %vm300_vm0, %v1428_v39 }
 0x2b9   :  { %v1381_v5 = vpop.permute.xlu1 %1380 }
 0x2ba   :  { %v1433_v28 = vadd.f32 %v1381_v5, %v1272_v4  ;;  %v1434_v22 = vadd.f32 %v1381_v5, %v1273_v6 }
 0x2bc   :  { %1479 = vst [vmem:[#allocation2 + $0x140] sm:$0xff] %v1433_v28 }
 0x2bd   :  { %1480 = vst.msk [vmem:[#allocation2 + $0x148] sm:$0xff] %vm300_vm0, %v1434_v22 }
 0x2be   :  { %1497 = dma.vmem_to_hbm [thread:$0]  %s1490_s16, 5888, %s1492_s7, [#allocation3], %s1692_s8, %s1692_s8, %s1693_s9  }
 0x2bf   :  { %1686 = dma.done.wait [#allocation3], 5888  }
 0x2c0   :  { %1687 = vsyncadd [#allocation3], 4294961408 }
 0x2c1   :  { %1502 = vsyncpa [#allocation3], 1 }

</bundles_post_ra>
